<compile_context>
chip_gen: v7x
topology: tpu7x:2x2x1
jax: 0.10.0
libtpu: 0.0.40
codegen_flags: <defaults>
</compile_context>

<pallas_src>
import functools
import math

import jax
import jax.numpy as jnp
from jax.experimental import pallas as pl
from jax.experimental.pallas import tpu as pltpu


# ----------------------------------------------------------------------------
# Kernel
# ----------------------------------------------------------------------------
def transformer_block_kernel(x_ref, pad_ref,
                             ln1w_ref, ln1b_ref,
                             wqkv_ref, bqkv_ref, wo_ref, bo_ref,
                             ln2w_ref, ln2b_ref,
                             w1_ref, b1_ref, w2_ref, b2_ref,
                             o_ref, ctx_ref, *, num_heads, head_dim):
    Bb, T, H = x_ref.shape
    eps = jnp.float32(1e-5)

    def layer_norm(v, gamma, beta):
        mean = jnp.mean(v, axis=-1, keepdims=True)
        cent = v - mean
        var = jnp.mean(cent * cent, axis=-1, keepdims=True)
        return cent * jax.lax.rsqrt(var + eps) * gamma + beta

    # ---- LayerNorm 1 + fused QKV projection (batch rows folded into M) ----
    x2 = x_ref[...].astype(jnp.float32).reshape(Bb * T, H)
    xn = layer_norm(x2, ln1w_ref[0], ln1b_ref[0])                 # (Bb*T, H)
    wqkv = wqkv_ref[...]
    qkv = jnp.dot(xn.astype(wqkv.dtype), wqkv,
                  preferred_element_type=jnp.float32) + bqkv_ref[0]
    q = qkv[:, 0 * H:1 * H].reshape(Bb, T, H)
    k = qkv[:, 1 * H:2 * H].reshape(Bb, T, H)
    v = qkv[:, 2 * H:3 * H].reshape(Bb, T, H)

    # ---- Attention bias: strict-causal (upper triangle) + key padding -----
    row = jax.lax.broadcasted_iota(jnp.int32, (T, T), 0)
    col = jax.lax.broadcasted_iota(jnp.int32, (T, T), 1)
    neg = jnp.float32(-1e30)
    bias = jnp.where(col > row, neg, jnp.float32(0.0))[None] + pad_ref[...]  # (Bb,T,T)

    # ---- Multi-head attention: static head loop, batched over Bb rows -----
    scale = jnp.float32(1.0 / math.sqrt(head_dim))
    for h in range(num_heads):
        lo, hi = h * head_dim, (h + 1) * head_dim
        qh, kh, vh = q[:, :, lo:hi], k[:, :, lo:hi], v[:, :, lo:hi]
        # QK^T: contraction on the last dim of both operands -> no explicit
        # transpose is materialized (folded into the MXU operand feed).
        s = jnp.einsum('btd,bsd->bts', qh, kh,
                       preferred_element_type=jnp.float32) * scale + bias
        m = jnp.max(s, axis=-1, keepdims=True)
        p = jnp.exp(s - m)
        a = p * pl.reciprocal(jnp.sum(p, axis=-1, keepdims=True), approx=True)
        # Per-head context goes into the shared (Bb, T, H) scratch at its
        # lane offset; the output projection is fused into ONE matmul below.
        ctx_ref[:, :, lo:hi] = jnp.einsum('bts,bsd->btd', a.astype(vh.dtype),
                                          vh, preferred_element_type=jnp.float32)

    # ---- Single fused output projection over all heads (K = H) ------------
    wo = wo_ref[...]
    ctx = ctx_ref[...].reshape(Bb * T, H)
    attn_out = jnp.dot(ctx.astype(wo.dtype), wo,
                       preferred_element_type=jnp.float32) + bo_ref[0]

    # TODO(synk): attention_dropout / residual_dropout are identity (eval
    # mode); training-mode dropout would need pltpu.prng_seed/prng_random_bits.
    # PyTorch reassigns x = norm1(x) before attention, so the residual is
    # added to the NORMED activations (matches the module exactly).
    xr = xn + attn_out

    # ---- LayerNorm 2 + MLP -------------------------------------------------
    xn2 = layer_norm(xr, ln2w_ref[0], ln2b_ref[0])
    w1 = w1_ref[...]
    hmid = jnp.dot(xn2.astype(w1.dtype), w1,
                   preferred_element_type=jnp.float32) + b1_ref[0]
    # TODO(synk): PyTorch nn.GELU defaults to exact erf; tanh approximation is
    # used because erf is not guaranteed to lower in Mosaic (~1e-3 rel diff).
    c = jnp.float32(0.7978845608028654)
    hmid = 0.5 * hmid * (1.0 + jnp.tanh(c * (hmid + 0.044715 * hmid * hmid * hmid)))
    w2 = w2_ref[...]
    y = jnp.dot(hmid.astype(w2.dtype), w2,
                preferred_element_type=jnp.float32) + b2_ref[0]

    o_ref[...] = (xr + y).reshape(Bb, T, H).astype(o_ref.dtype)


# ----------------------------------------------------------------------------
# Wrapper
# ----------------------------------------------------------------------------
def _pick_block_batch(batch, seq_len):
    """Rows per grid step: aim for matmul M-dim >= 128 (fills the MXU and
    amortizes per-step pipeline overhead) while keeping >= 2 grid steps when
    the batch allows it (so v7x's two TensorCores both get work)."""
    target = max(1, pl.cdiv(128, seq_len))
    best = 1
    for cand in range(1, batch + 1):
        if batch % cand != 0 or cand > target:
            continue
        if batch // cand >= 2 or batch == cand == 1:
            best = cand
    return best


def transformer_block_forward(x, padding_mask, params, *, num_heads,
                              block_batch=None):
    """x: (B, T, H) f32; padding_mask: (B, T) bool (True = padded key)."""
    B, T, H = x.shape
    assert H % num_heads == 0
    head_dim = H // num_heads

    (ln1_w, ln1_b, w_qkv, b_qkv, w_out, b_out,
     ln2_w, ln2_b, w_mlp1, b_mlp1, w_mlp2, b_mlp2) = params

    if block_batch is None:
        block_batch = _pick_block_batch(B, T)
    Bb = int(block_batch)
    assert B % Bb == 0
    num_blocks = B // Bb

    # Key-padding bias as a lane-resident f32 vector, one row per batch elem.
    pad_bias = jnp.where(padding_mask, jnp.float32(-1e30),
                         jnp.float32(0.0)).reshape(B, 1, T)

    kernel = functools.partial(transformer_block_kernel,
                               num_heads=num_heads, head_dim=head_dim)

    const2d = lambda b: (0, 0)   # weights: resident, same block every step

    flops_per_row = (2 * T * H * 3 * H        # qkv proj
                     + 4 * T * T * H          # scores + ctx over all heads
                     + 2 * T * H * H          # out proj
                     + 4 * T * H * H)         # 2-layer MLP
    param_bytes = int(sum(int(p.size) * p.dtype.itemsize for p in params))
    cost = pl.CostEstimate(
        flops=int(B * flops_per_row),
        transcendentals=int(B * (num_heads * T * T + T * H
                                 + num_heads * T + 2 * T)),
        bytes_accessed=int(2 * B * T * H * x.dtype.itemsize
                           + B * T * 4 + param_bytes),
    )

    # Explicit scoped-VMEM budget: double-buffered activation blocks +
    # resident weights (default double-buffered) + ctx scratch, with slack.
    block_bytes = 2 * Bb * T * H * x.dtype.itemsize + Bb * T * 4
    vmem_limit = int(min(64 * 1024 * 1024,
                         max(32 * 1024 * 1024, 4 * (param_bytes + block_bytes))))

    return pl.pallas_call(
        kernel,
        out_shape=jax.ShapeDtypeStruct((B, T, H), x.dtype),
        grid_spec=pltpu.PrefetchScalarGridSpec(
            num_scalar_prefetch=0,
            grid=(num_blocks,),
            in_specs=[
                pl.BlockSpec((Bb, T, H), lambda b: (b, 0, 0)),   # x
                pl.BlockSpec((Bb, 1, T), lambda b: (b, 0, 0)),   # key-padding bias
                pl.BlockSpec((1, H), const2d),                   # ln1 gamma
                pl.BlockSpec((1, H), const2d),                   # ln1 beta
                pl.BlockSpec((H, 3 * H), const2d),               # W_qkv (in,out)
                pl.BlockSpec((1, 3 * H), const2d),               # b_qkv
                pl.BlockSpec((H, H), const2d),                   # W_out (in,out)
                pl.BlockSpec((1, H), const2d),                   # b_out
                pl.BlockSpec((1, H), const2d),                   # ln2 gamma
                pl.BlockSpec((1, H), const2d),                   # ln2 beta
                pl.BlockSpec((H, H), const2d),                   # W_mlp1 (in,out)
                pl.BlockSpec((1, H), const2d),                   # b_mlp1
                pl.BlockSpec((H, H), const2d),                   # W_mlp2 (in,out)
                pl.BlockSpec((1, H), const2d),                   # b_mlp2
            ],
            out_specs=pl.BlockSpec((Bb, T, H), lambda b: (b, 0, 0)),
            scratch_shapes=[pltpu.VMEM((Bb, T, H), jnp.float32)],   # ctx buffer
        ),
        compiler_params=pltpu.CompilerParams(
            dimension_semantics=("parallel",),
            vmem_limit_bytes=vmem_limit),
        cost_estimate=cost,
    )(x, pad_bias, ln1_w, ln1_b, w_qkv, b_qkv, w_out, b_out,
      ln2_w, ln2_b, w_mlp1, b_mlp1, w_mlp2, b_mlp2)


# ----------------------------------------------------------------------------
# Params + pure-JAX reference
# ----------------------------------------------------------------------------
def init_params(key, hidden_dim, dtype=jnp.float32):
    H = hidden_dim
    ks = jax.random.split(key, 12)

    def uni(k, shape, fan_in):
        bound = 1.0 / math.sqrt(fan_in)
        return jax.random.uniform(k, shape, dtype, -bound, bound)

    ln1_w = jnp.ones((1, H), dtype) + 0.1 * jax.random.normal(ks[0], (1, H), dtype)
    ln1_b = 0.1 * jax.random.normal(ks[1], (1, H), dtype)
    w_qkv = uni(ks[2], (H, 3 * H), H)      # in_proj_weight.T
    b_qkv = uni(ks[3], (1, 3 * H), H)
    w_out = uni(ks[4], (H, H), H)          # out_proj.weight.T
    b_out = uni(ks[5], (1, H), H)
    ln2_w = jnp.ones((1, H), dtype) + 0.1 * jax.random.normal(ks[6], (1, H), dtype)
    ln2_b = 0.1 * jax.random.normal(ks[7], (1, H), dtype)
    w_mlp1 = uni(ks[8], (H, H), H)
    b_mlp1 = uni(ks[9], (1, H), H)
    w_mlp2 = uni(ks[10], (H, H), H)
    b_mlp2 = uni(ks[11], (1, H), H)
    return (ln1_w, ln1_b, w_qkv, b_qkv, w_out, b_out,
            ln2_w, ln2_b, w_mlp1, b_mlp1, w_mlp2, b_mlp2)


def reference_forward(x, padding_mask, params, *, num_heads):
    (ln1_w, ln1_b, w_qkv, b_qkv, w_out, b_out,
     ln2_w, ln2_b, w_mlp1, b_mlp1, w_mlp2, b_mlp2) = params
    B, T, H = x.shape
    dh = H // num_heads
    hp = jax.lax.Precision.HIGHEST
    xf = x.astype(jnp.float32)

    def ln(v, g, b):
        m = jnp.mean(v, -1, keepdims=True)
        c = v - m
        var = jnp.mean(c * c, -1, keepdims=True)
        return c * jax.lax.rsqrt(var + 1e-5) * g + b

    xn = ln(xf, ln1_w[0], ln1_b[0])
    qkv = jnp.dot(xn, w_qkv.astype(jnp.float32), precision=hp) + b_qkv[0]
    q, k, v = qkv[..., :H], qkv[..., H:2 * H], qkv[..., 2 * H:]
    q = q.reshape(B, T, num_heads, dh).transpose(0, 2, 1, 3)
    k = k.reshape(B, T, num_heads, dh).transpose(0, 2, 1, 3)
    v = v.reshape(B, T, num_heads, dh).transpose(0, 2, 1, 3)
    scores = jnp.einsum('bhtd,bhsd->bhts', q, k, precision=hp) / math.sqrt(dh)
    neg = jnp.float32(-1e30)
    causal = jnp.triu(jnp.full((T, T), neg, jnp.float32), k=1)
    kp = jnp.where(padding_mask, neg, jnp.float32(0.0))
    scores = scores + causal[None, None] + kp[:, None, None, :]
    a = jax.nn.softmax(scores, axis=-1)
    ctx = jnp.einsum('bhts,bhsd->bhtd', a, v, precision=hp)
    ctx = ctx.transpose(0, 2, 1, 3).reshape(B, T, H)
    attn_out = jnp.dot(ctx, w_out.astype(jnp.float32), precision=hp) + b_out[0]
    # PyTorch: x = norm1(x); x = x + drop(attn)  -> residual on the NORMED x.
    xr = xn + attn_out
    xn2 = ln(xr, ln2_w[0], ln2_b[0])
    h = jnp.dot(xn2, w_mlp1.astype(jnp.float32), precision=hp) + b_mlp1[0]
    c = 0.7978845608028654
    h = 0.5 * h * (1.0 + jnp.tanh(c * (h + 0.044715 * h ** 3)))
    y = jnp.dot(h, w_mlp2.astype(jnp.float32), precision=hp) + b_mlp2[0]
    return (xr + y).astype(x.dtype)


# ----------------------------------------------------------------------------
if __name__ == "__main__":
    seq_len, hidden_dim, num_heads, batch = 8, 32, 4, 4

    key = jax.random.PRNGKey(0)
    kx, kparams = jax.random.split(key)
    x = jax.random.normal(kx, (batch, seq_len, hidden_dim), jnp.float32)
    # key_padding_mask: True = padded key.
    padding_mask = jnp.zeros((batch, seq_len), jnp.bool_)
    padding_mask = padding_mask.at[1, seq_len - 2:].set(True)
    padding_mask = padding_mask.at[3, seq_len - 3:].set(True)
    params = init_params(kparams, hidden_dim)

    out = transformer_block_forward(x, padding_mask, params, num_heads=num_heads)
    out = jax.block_until_ready(out)

    ref = reference_forward(x, padding_mask, params, num_heads=num_heads)
    assert out.shape == (batch, seq_len, hidden_dim)
    max_err = float(jnp.max(jnp.abs(out - ref)))
    assert jnp.allclose(out, ref, atol=2e-2, rtol=2e-2), f"max_err={max_err}"

    print("KERNEL_OK")
</pallas_src>

<mosaic_0001>
module attributes {stable_mosaic.version = 11 : i64} {
  func.func @transformer_block_kernel(%arg0: i32, %arg1: memref<2x8x32xf32, #tpu.memory_space<vmem>>, %arg2: memref<2x1x8xf32, #tpu.memory_space<vmem>>, %arg3: memref<1x32xf32, #tpu.memory_space<vmem>>, %arg4: memref<1x32xf32, #tpu.memory_space<vmem>>, %arg5: memref<32x96xf32, #tpu.memory_space<vmem>>, %arg6: memref<1x96xf32, #tpu.memory_space<vmem>>, %arg7: memref<32x32xf32, #tpu.memory_space<vmem>>, %arg8: memref<1x32xf32, #tpu.memory_space<vmem>>, %arg9: memref<1x32xf32, #tpu.memory_space<vmem>>, %arg10: memref<1x32xf32, #tpu.memory_space<vmem>>, %arg11: memref<32x32xf32, #tpu.memory_space<vmem>>, %arg12: memref<1x32xf32, #tpu.memory_space<vmem>>, %arg13: memref<32x32xf32, #tpu.memory_space<vmem>>, %arg14: memref<1x32xf32, #tpu.memory_space<vmem>>, %arg15: memref<2x8x32xf32, #tpu.memory_space<vmem>>, %arg16: memref<2x8x32xf32, #tpu.memory_space<vmem>>) attributes {dimension_semantics = [#tpu.dimension_semantics<parallel>], iteration_bounds = array<i64: 2>, scalar_prefetch = 0 : i64, scratch_operands = 1 : i64, tpu.core_type = #tpu.core_type<tc>, window_params = [{transform_indices = @transform_0, window_bounds = array<i64: 2, 8, 32>}, {transform_indices = @transform_1, window_bounds = array<i64: 2, 1, 8>}, {pipeline_mode = #tpu.pipeline_mode<synchronous>, transform_indices = @transform_2, window_bounds = array<i64: 1, 32>}, {pipeline_mode = #tpu.pipeline_mode<synchronous>, transform_indices = @transform_3, window_bounds = array<i64: 1, 32>}, {pipeline_mode = #tpu.pipeline_mode<synchronous>, transform_indices = @transform_4, window_bounds = array<i64: 32, 96>}, {pipeline_mode = #tpu.pipeline_mode<synchronous>, transform_indices = @transform_5, window_bounds = array<i64: 1, 96>}, {pipeline_mode = #tpu.pipeline_mode<synchronous>, transform_indices = @transform_6, window_bounds = array<i64: 32, 32>}, {pipeline_mode = #tpu.pipeline_mode<synchronous>, transform_indices = @transform_7, window_bounds = array<i64: 1, 32>}, {pipeline_mode = #tpu.pipeline_mode<synchronous>, transform_indices = @transform_8, window_bounds = array<i64: 1, 32>}, {pipeline_mode = #tpu.pipeline_mode<synchronous>, transform_indices = @transform_9, window_bounds = array<i64: 1, 32>}, {pipeline_mode = #tpu.pipeline_mode<synchronous>, transform_indices = @transform_10, window_bounds = array<i64: 32, 32>}, {pipeline_mode = #tpu.pipeline_mode<synchronous>, transform_indices = @transform_11, window_bounds = array<i64: 1, 32>}, {pipeline_mode = #tpu.pipeline_mode<synchronous>, transform_indices = @transform_12, window_bounds = array<i64: 32, 32>}, {pipeline_mode = #tpu.pipeline_mode<synchronous>, transform_indices = @transform_13, window_bounds = array<i64: 1, 32>}, {transform_indices = @transform_14, window_bounds = array<i64: 2, 8, 32>}]} {
    %c0 = arith.constant 0 : index
    %c0_0 = arith.constant 0 : index
    %c0_1 = arith.constant 0 : index
    %0 = vector.load %arg1[%c0, %c0_0, %c0_1] : memref<2x8x32xf32, #tpu.memory_space<vmem>>, vector<2x8x32xf32>
    %1 = vector.shape_cast %0 : vector<2x8x32xf32> to vector<16x32xf32>
    %c0_2 = arith.constant 0 : index
    %c0_3 = arith.constant 0 : index
    %2 = vector.load %arg3[%c0_2, %c0_3] : memref<1x32xf32, #tpu.memory_space<vmem>>, vector<1x32xf32>
    %3 = vector.shape_cast %2 : vector<1x32xf32> to vector<32xf32>
    %c0_4 = arith.constant 0 : index
    %c0_5 = arith.constant 0 : index
    %4 = vector.load %arg4[%c0_4, %c0_5] : memref<1x32xf32, #tpu.memory_space<vmem>>, vector<1x32xf32>
    %5 = vector.shape_cast %4 : vector<1x32xf32> to vector<32xf32>
    %cst = arith.constant dense<0.000000e+00> : vector<16xf32>
    %6 = vector.multi_reduction <add>, %1, %cst [1] : vector<16x32xf32> to vector<16xf32>
    %7 = vector.shape_cast %6 : vector<16xf32> to vector<16x1xf32>
    %cst_6 = arith.constant 3.200000e+01 : f32
    %8 = vector.broadcast %cst_6 : f32 to vector<16x1xf32>
    %9 = arith.divf %7, %8 : vector<16x1xf32>
    %10 = vector.broadcast %9 : vector<16x1xf32> to vector<16x32xf32>
    %11 = arith.subf %1, %10 : vector<16x32xf32>
    %12 = arith.mulf %11, %11 : vector<16x32xf32>
    %cst_7 = arith.constant dense<0.000000e+00> : vector<16xf32>
    %13 = vector.multi_reduction <add>, %12, %cst_7 [1] : vector<16x32xf32> to vector<16xf32>
    %14 = vector.shape_cast %13 : vector<16xf32> to vector<16x1xf32>
    %cst_8 = arith.constant 3.200000e+01 : f32
    %15 = vector.broadcast %cst_8 : f32 to vector<16x1xf32>
    %16 = arith.divf %14, %15 : vector<16x1xf32>
    %cst_9 = arith.constant 9.99999974E-6 : f32
    %17 = vector.broadcast %cst_9 : f32 to vector<16x1xf32>
    %18 = arith.addf %16, %17 : vector<16x1xf32>
    %19 = math.rsqrt %18 : vector<16x1xf32>
    %20 = vector.broadcast %19 : vector<16x1xf32> to vector<16x32xf32>
    %21 = arith.mulf %11, %20 : vector<16x32xf32>
    %22 = vector.shape_cast %3 : vector<32xf32> to vector<1x32xf32>
    %23 = vector.broadcast %22 : vector<1x32xf32> to vector<16x32xf32>
    %24 = arith.mulf %21, %23 : vector<16x32xf32>
    %25 = vector.shape_cast %5 : vector<32xf32> to vector<1x32xf32>
    %26 = vector.broadcast %25 : vector<1x32xf32> to vector<16x32xf32>
    %27 = arith.addf %24, %26 : vector<16x32xf32>
    %c0_10 = arith.constant 0 : index
    %c0_11 = arith.constant 0 : index
    %28 = vector.load %arg5[%c0_10, %c0_11] : memref<32x96xf32, #tpu.memory_space<vmem>>, vector<32x96xf32>
    %cst_12 = arith.constant dense<0.000000e+00> : vector<16x96xf32>
    %29 = tpu.matmul %27, %28, %cst_12 {dimension_numbers = #tpu.dot_dimension_numbers<[1], [0], [0], [1], [0, 0, 1, 1], [], []>} : vector<16x32xf32>, vector<32x96xf32>, vector<16x96xf32> -> vector<16x96xf32>
    %c0_13 = arith.constant 0 : index
    %c0_14 = arith.constant 0 : index
    %30 = vector.load %arg6[%c0_13, %c0_14] : memref<1x96xf32, #tpu.memory_space<vmem>>, vector<1x96xf32>
    %31 = vector.shape_cast %30 : vector<1x96xf32> to vector<96xf32>
    %32 = vector.shape_cast %31 : vector<96xf32> to vector<1x96xf32>
    %33 = vector.broadcast %32 : vector<1x96xf32> to vector<16x96xf32>
    %34 = arith.addf %29, %33 : vector<16x96xf32>
    %35 = vector.extract_strided_slice %34 {offsets = [0, 0], sizes = [16, 32], strides = [1, 1]} : vector<16x96xf32> to vector<16x32xf32>
    %36 = vector.shape_cast %35 : vector<16x32xf32> to vector<2x8x32xf32>
    %37 = vector.extract_strided_slice %34 {offsets = [0, 32], sizes = [16, 32], strides = [1, 1]} : vector<16x96xf32> to vector<16x32xf32>
    %38 = vector.shape_cast %37 : vector<16x32xf32> to vector<2x8x32xf32>
    %39 = vector.extract_strided_slice %34 {offsets = [0, 64], sizes = [16, 32], strides = [1, 1]} : vector<16x96xf32> to vector<16x32xf32>
    %40 = vector.shape_cast %39 : vector<16x32xf32> to vector<2x8x32xf32>
    %41 = tpu.iota {dimensions = array<i32: 0>} : vector<8x8xi32>
    %42 = tpu.iota {dimensions = array<i32: 1>} : vector<8x8xi32>
    %43 = arith.cmpi sgt, %42, %41 : vector<8x8xi32>
    %cst_15 = arith.constant -1.000000e+30 : f32
    %cst_16 = arith.constant 0.000000e+00 : f32
    %44 = vector.broadcast %cst_15 : f32 to vector<8x8xf32>
    %45 = vector.broadcast %cst_16 : f32 to vector<8x8xf32>
    %46 = arith.select %43, %44, %45 : vector<8x8xi1>, vector<8x8xf32>
    %47 = vector.shape_cast %46 : vector<8x8xf32> to vector<1x8x8xf32>
    %c0_17 = arith.constant 0 : index
    %c0_18 = arith.constant 0 : index
    %c0_19 = arith.constant 0 : index
    %48 = vector.load %arg2[%c0_17, %c0_18, %c0_19] : memref<2x1x8xf32, #tpu.memory_space<vmem>>, vector<2x1x8xf32>
    %49 = vector.broadcast %47 : vector<1x8x8xf32> to vector<2x8x8xf32>
    %50 = vector.broadcast %48 : vector<2x1x8xf32> to vector<2x8x8xf32>
    %51 = arith.addf %49, %50 : vector<2x8x8xf32>
    %52 = vector.extract_strided_slice %36 {offsets = [0, 0, 0], sizes = [2, 8, 8], strides = [1, 1, 1]} : vector<2x8x32xf32> to vector<2x8x8xf32>
    %53 = vector.extract_strided_slice %38 {offsets = [0, 0, 0], sizes = [2, 8, 8], strides = [1, 1, 1]} : vector<2x8x32xf32> to vector<2x8x8xf32>
    %54 = vector.extract_strided_slice %40 {offsets = [0, 0, 0], sizes = [2, 8, 8], strides = [1, 1, 1]} : vector<2x8x32xf32> to vector<2x8x8xf32>
    "tpu.trace_start"() <{level = 10 : i32, message = "btd,bsd->bts"}> : () -> ()
    %cst_20 = arith.constant dense<0.000000e+00> : vector<2x8x8xf32>
    %55 = tpu.matmul %52, %53, %cst_20 {dimension_numbers = #tpu.dot_dimension_numbers<[2], [2], [1], [1], [0, 0, 0, 1, 1, 1], [0], [0]>} : vector<2x8x8xf32>, vector<2x8x8xf32>, vector<2x8x8xf32> -> vector<2x8x8xf32>
    "tpu.trace_stop"() : () -> ()
    %cst_21 = arith.constant 0.353553385 : f32
    %56 = vector.broadcast %cst_21 : f32 to vector<2x8x8xf32>
    %57 = arith.mulf %55, %56 : vector<2x8x8xf32>
    %58 = arith.addf %57, %51 : vector<2x8x8xf32>
    %cst_22 = arith.constant dense<0xFF800000> : vector<2x8xf32>
    %59 = vector.multi_reduction <maximumf>, %58, %cst_22 [2] : vector<2x8x8xf32> to vector<2x8xf32>
    %60 = vector.shape_cast %59 : vector<2x8xf32> to vector<2x8x1xf32>
    %61 = vector.broadcast %60 : vector<2x8x1xf32> to vector<2x8x8xf32>
    %62 = arith.subf %58, %61 : vector<2x8x8xf32>
    %63 = math.exp %62 : vector<2x8x8xf32>
    %cst_23 = arith.constant dense<0.000000e+00> : vector<2x8xf32>
    %64 = vector.multi_reduction <add>, %63, %cst_23 [2] : vector<2x8x8xf32> to vector<2x8xf32>
    %65 = vector.shape_cast %64 : vector<2x8xf32> to vector<2x8x1xf32>
    %66 = tpu.reciprocal %65 {approx = true} : vector<2x8x1xf32> -> vector<2x8x1xf32>
    %67 = vector.broadcast %66 : vector<2x8x1xf32> to vector<2x8x8xf32>
    %68 = arith.mulf %63, %67 : vector<2x8x8xf32>
    "tpu.trace_start"() <{level = 10 : i32, message = "bts,bsd->btd"}> : () -> ()
    %cst_24 = arith.constant dense<0.000000e+00> : vector<2x8x8xf32>
    %69 = tpu.matmul %68, %54, %cst_24 {dimension_numbers = #tpu.dot_dimension_numbers<[2], [1], [1], [2], [0, 0, 0, 1, 1, 2], [0], [0]>} : vector<2x8x8xf32>, vector<2x8x8xf32>, vector<2x8x8xf32> -> vector<2x8x8xf32>
    "tpu.trace_stop"() : () -> ()
    %c0_25 = arith.constant 0 : index
    %c0_26 = arith.constant 0 : index
    %c0_27 = arith.constant 0 : index
    %70 = vector.load %arg16[%c0_25, %c0_26, %c0_27] : memref<2x8x32xf32, #tpu.memory_space<vmem>>, vector<2x8x8xf32>
    tpu.vector_store %arg16[%c0_25, %c0_26, %c0_27], %69 {strides = array<i32>} : memref<2x8x32xf32, #tpu.memory_space<vmem>>, vector<2x8x8xf32>,
    %71 = vector.extract_strided_slice %36 {offsets = [0, 0, 8], sizes = [2, 8, 8], strides = [1, 1, 1]} : vector<2x8x32xf32> to vector<2x8x8xf32>
    %72 = vector.extract_strided_slice %38 {offsets = [0, 0, 8], sizes = [2, 8, 8], strides = [1, 1, 1]} : vector<2x8x32xf32> to vector<2x8x8xf32>
    %73 = vector.extract_strided_slice %40 {offsets = [0, 0, 8], sizes = [2, 8, 8], strides = [1, 1, 1]} : vector<2x8x32xf32> to vector<2x8x8xf32>
    "tpu.trace_start"() <{level = 10 : i32, message = "btd,bsd->bts"}> : () -> ()
    %cst_28 = arith.constant dense<0.000000e+00> : vector<2x8x8xf32>
    %74 = tpu.matmul %71, %72, %cst_28 {dimension_numbers = #tpu.dot_dimension_numbers<[2], [2], [1], [1], [0, 0, 0, 1, 1, 1], [0], [0]>} : vector<2x8x8xf32>, vector<2x8x8xf32>, vector<2x8x8xf32> -> vector<2x8x8xf32>
    "tpu.trace_stop"() : () -> ()
    %cst_29 = arith.constant 0.353553385 : f32
    %75 = vector.broadcast %cst_29 : f32 to vector<2x8x8xf32>
    %76 = arith.mulf %74, %75 : vector<2x8x8xf32>
    %77 = arith.addf %76, %51 : vector<2x8x8xf32>
    %cst_30 = arith.constant dense<0xFF800000> : vector<2x8xf32>
    %78 = vector.multi_reduction <maximumf>, %77, %cst_30 [2] : vector<2x8x8xf32> to vector<2x8xf32>
    %79 = vector.shape_cast %78 : vector<2x8xf32> to vector<2x8x1xf32>
    %80 = vector.broadcast %79 : vector<2x8x1xf32> to vector<2x8x8xf32>
    %81 = arith.subf %77, %80 : vector<2x8x8xf32>
    %82 = math.exp %81 : vector<2x8x8xf32>
    %cst_31 = arith.constant dense<0.000000e+00> : vector<2x8xf32>
    %83 = vector.multi_reduction <add>, %82, %cst_31 [2] : vector<2x8x8xf32> to vector<2x8xf32>
    %84 = vector.shape_cast %83 : vector<2x8xf32> to vector<2x8x1xf32>
    %85 = tpu.reciprocal %84 {approx = true} : vector<2x8x1xf32> -> vector<2x8x1xf32>
    %86 = vector.broadcast %85 : vector<2x8x1xf32> to vector<2x8x8xf32>
    %87 = arith.mulf %82, %86 : vector<2x8x8xf32>
    "tpu.trace_start"() <{level = 10 : i32, message = "bts,bsd->btd"}> : () -> ()
    %cst_32 = arith.constant dense<0.000000e+00> : vector<2x8x8xf32>
    %88 = tpu.matmul %87, %73, %cst_32 {dimension_numbers = #tpu.dot_dimension_numbers<[2], [1], [1], [2], [0, 0, 0, 1, 1, 2], [0], [0]>} : vector<2x8x8xf32>, vector<2x8x8xf32>, vector<2x8x8xf32> -> vector<2x8x8xf32>
    "tpu.trace_stop"() : () -> ()
    %c0_33 = arith.constant 0 : index
    %c0_34 = arith.constant 0 : index
    %c8 = arith.constant 8 : index
    %89 = vector.load %arg16[%c0_33, %c0_34, %c8] : memref<2x8x32xf32, #tpu.memory_space<vmem>>, vector<2x8x8xf32>
    tpu.vector_store %arg16[%c0_33, %c0_34, %c8], %88 {strides = array<i32>} : memref<2x8x32xf32, #tpu.memory_space<vmem>>, vector<2x8x8xf32>,
    %90 = vector.extract_strided_slice %36 {offsets = [0, 0, 16], sizes = [2, 8, 8], strides = [1, 1, 1]} : vector<2x8x32xf32> to vector<2x8x8xf32>
    %91 = vector.extract_strided_slice %38 {offsets = [0, 0, 16], sizes = [2, 8, 8], strides = [1, 1, 1]} : vector<2x8x32xf32> to vector<2x8x8xf32>
    %92 = vector.extract_strided_slice %40 {offsets = [0, 0, 16], sizes = [2, 8, 8], strides = [1, 1, 1]} : vector<2x8x32xf32> to vector<2x8x8xf32>
    "tpu.trace_start"() <{level = 10 : i32, message = "btd,bsd->bts"}> : () -> ()
    %cst_35 = arith.constant dense<0.000000e+00> : vector<2x8x8xf32>
    %93 = tpu.matmul %90, %91, %cst_35 {dimension_numbers = #tpu.dot_dimension_numbers<[2], [2], [1], [1], [0, 0, 0, 1, 1, 1], [0], [0]>} : vector<2x8x8xf32>, vector<2x8x8xf32>, vector<2x8x8xf32> -> vector<2x8x8xf32>
    "tpu.trace_stop"() : () -> ()
    %cst_36 = arith.constant 0.353553385 : f32
    %94 = vector.broadcast %cst_36 : f32 to vector<2x8x8xf32>
    %95 = arith.mulf %93, %94 : vector<2x8x8xf32>
    %96 = arith.addf %95, %51 : vector<2x8x8xf32>
    %cst_37 = arith.constant dense<0xFF800000> : vector<2x8xf32>
    %97 = vector.multi_reduction <maximumf>, %96, %cst_37 [2] : vector<2x8x8xf32> to vector<2x8xf32>
    %98 = vector.shape_cast %97 : vector<2x8xf32> to vector<2x8x1xf32>
    %99 = vector.broadcast %98 : vector<2x8x1xf32> to vector<2x8x8xf32>
    %100 = arith.subf %96, %99 : vector<2x8x8xf32>
    %101 = math.exp %100 : vector<2x8x8xf32>
    %cst_38 = arith.constant dense<0.000000e+00> : vector<2x8xf32>
    %102 = vector.multi_reduction <add>, %101, %cst_38 [2] : vector<2x8x8xf32> to vector<2x8xf32>
    %103 = vector.shape_cast %102 : vector<2x8xf32> to vector<2x8x1xf32>
    %104 = tpu.reciprocal %103 {approx = true} : vector<2x8x1xf32> -> vector<2x8x1xf32>
    %105 = vector.broadcast %104 : vector<2x8x1xf32> to vector<2x8x8xf32>
    %106 = arith.mulf %101, %105 : vector<2x8x8xf32>
    "tpu.trace_start"() <{level = 10 : i32, message = "bts,bsd->btd"}> : () -> ()
    %cst_39 = arith.constant dense<0.000000e+00> : vector<2x8x8xf32>
    %107 = tpu.matmul %106, %92, %cst_39 {dimension_numbers = #tpu.dot_dimension_numbers<[2], [1], [1], [2], [0, 0, 0, 1, 1, 2], [0], [0]>} : vector<2x8x8xf32>, vector<2x8x8xf32>, vector<2x8x8xf32> -> vector<2x8x8xf32>
    "tpu.trace_stop"() : () -> ()
    %c0_40 = arith.constant 0 : index
    %c0_41 = arith.constant 0 : index
    %c16 = arith.constant 16 : index
    %108 = vector.load %arg16[%c0_40, %c0_41, %c16] : memref<2x8x32xf32, #tpu.memory_space<vmem>>, vector<2x8x8xf32>
    tpu.vector_store %arg16[%c0_40, %c0_41, %c16], %107 {strides = array<i32>} : memref<2x8x32xf32, #tpu.memory_space<vmem>>, vector<2x8x8xf32>,
    %109 = vector.extract_strided_slice %36 {offsets = [0, 0, 24], sizes = [2, 8, 8], strides = [1, 1, 1]} : vector<2x8x32xf32> to vector<2x8x8xf32>
    %110 = vector.extract_strided_slice %38 {offsets = [0, 0, 24], sizes = [2, 8, 8], strides = [1, 1, 1]} : vector<2x8x32xf32> to vector<2x8x8xf32>
    %111 = vector.extract_strided_slice %40 {offsets = [0, 0, 24], sizes = [2, 8, 8], strides = [1, 1, 1]} : vector<2x8x32xf32> to vector<2x8x8xf32>
    "tpu.trace_start"() <{level = 10 : i32, message = "btd,bsd->bts"}> : () -> ()
    %cst_42 = arith.constant dense<0.000000e+00> : vector<2x8x8xf32>
    %112 = tpu.matmul %109, %110, %cst_42 {dimension_numbers = #tpu.dot_dimension_numbers<[2], [2], [1], [1], [0, 0, 0, 1, 1, 1], [0], [0]>} : vector<2x8x8xf32>, vector<2x8x8xf32>, vector<2x8x8xf32> -> vector<2x8x8xf32>
    "tpu.trace_stop"() : () -> ()
    %cst_43 = arith.constant 0.353553385 : f32
    %113 = vector.broadcast %cst_43 : f32 to vector<2x8x8xf32>
    %114 = arith.mulf %112, %113 : vector<2x8x8xf32>
    %115 = arith.addf %114, %51 : vector<2x8x8xf32>
    %cst_44 = arith.constant dense<0xFF800000> : vector<2x8xf32>
    %116 = vector.multi_reduction <maximumf>, %115, %cst_44 [2] : vector<2x8x8xf32> to vector<2x8xf32>
    %117 = vector.shape_cast %116 : vector<2x8xf32> to vector<2x8x1xf32>
    %118 = vector.broadcast %117 : vector<2x8x1xf32> to vector<2x8x8xf32>
    %119 = arith.subf %115, %118 : vector<2x8x8xf32>
    %120 = math.exp %119 : vector<2x8x8xf32>
    %cst_45 = arith.constant dense<0.000000e+00> : vector<2x8xf32>
    %121 = vector.multi_reduction <add>, %120, %cst_45 [2] : vector<2x8x8xf32> to vector<2x8xf32>
    %122 = vector.shape_cast %121 : vector<2x8xf32> to vector<2x8x1xf32>
    %123 = tpu.reciprocal %122 {approx = true} : vector<2x8x1xf32> -> vector<2x8x1xf32>
    %124 = vector.broadcast %123 : vector<2x8x1xf32> to vector<2x8x8xf32>
    %125 = arith.mulf %120, %124 : vector<2x8x8xf32>
    "tpu.trace_start"() <{level = 10 : i32, message = "bts,bsd->btd"}> : () -> ()
    %cst_46 = arith.constant dense<0.000000e+00> : vector<2x8x8xf32>
    %126 = tpu.matmul %125, %111, %cst_46 {dimension_numbers = #tpu.dot_dimension_numbers<[2], [1], [1], [2], [0, 0, 0, 1, 1, 2], [0], [0]>} : vector<2x8x8xf32>, vector<2x8x8xf32>, vector<2x8x8xf32> -> vector<2x8x8xf32>
    "tpu.trace_stop"() : () -> ()
    %c0_47 = arith.constant 0 : index
    %c0_48 = arith.constant 0 : index
    %c24 = arith.constant 24 : index
    %127 = vector.load %arg16[%c0_47, %c0_48, %c24] : memref<2x8x32xf32, #tpu.memory_space<vmem>>, vector<2x8x8xf32>
    tpu.vector_store %arg16[%c0_47, %c0_48, %c24], %126 {strides = array<i32>} : memref<2x8x32xf32, #tpu.memory_space<vmem>>, vector<2x8x8xf32>,
    %c0_49 = arith.constant 0 : index
    %c0_50 = arith.constant 0 : index
    %128 = vector.load %arg7[%c0_49, %c0_50] : memref<32x32xf32, #tpu.memory_space<vmem>>, vector<32x32xf32>
    %c0_51 = arith.constant 0 : index
    %c0_52 = arith.constant 0 : index
    %c0_53 = arith.constant 0 : index
    %129 = vector.load %arg16[%c0_51, %c0_52, %c0_53] : memref<2x8x32xf32, #tpu.memory_space<vmem>>, vector<2x8x32xf32>
    %130 = vector.shape_cast %129 : vector<2x8x32xf32> to vector<16x32xf32>
    %cst_54 = arith.constant dense<0.000000e+00> : vector<16x32xf32>
    %131 = tpu.matmul %130, %128, %cst_54 {dimension_numbers = #tpu.dot_dimension_numbers<[1], [0], [0], [1], [0, 0, 1, 1], [], []>} : vector<16x32xf32>, vector<32x32xf32>, vector<16x32xf32> -> vector<16x32xf32>
    %c0_55 = arith.constant 0 : index
    %c0_56 = arith.constant 0 : index
    %132 = vector.load %arg8[%c0_55, %c0_56] : memref<1x32xf32, #tpu.memory_space<vmem>>, vector<1x32xf32>
    %133 = vector.shape_cast %132 : vector<1x32xf32> to vector<32xf32>
    %134 = vector.shape_cast %133 : vector<32xf32> to vector<1x32xf32>
    %135 = vector.broadcast %134 : vector<1x32xf32> to vector<16x32xf32>
    %136 = arith.addf %131, %135 : vector<16x32xf32>
    %137 = arith.addf %27, %136 : vector<16x32xf32>
    %c0_57 = arith.constant 0 : index
    %c0_58 = arith.constant 0 : index
    %138 = vector.load %arg9[%c0_57, %c0_58] : memref<1x32xf32, #tpu.memory_space<vmem>>, vector<1x32xf32>
    %139 = vector.shape_cast %138 : vector<1x32xf32> to vector<32xf32>
    %c0_59 = arith.constant 0 : index
    %c0_60 = arith.constant 0 : index
    %140 = vector.load %arg10[%c0_59, %c0_60] : memref<1x32xf32, #tpu.memory_space<vmem>>, vector<1x32xf32>
    %141 = vector.shape_cast %140 : vector<1x32xf32> to vector<32xf32>
    %cst_61 = arith.constant dense<0.000000e+00> : vector<16xf32>
    %142 = vector.multi_reduction <add>, %137, %cst_61 [1] : vector<16x32xf32> to vector<16xf32>
    %143 = vector.shape_cast %142 : vector<16xf32> to vector<16x1xf32>
    %cst_62 = arith.constant 3.200000e+01 : f32
    %144 = vector.broadcast %cst_62 : f32 to vector<16x1xf32>
    %145 = arith.divf %143, %144 : vector<16x1xf32>
    %146 = vector.broadcast %145 : vector<16x1xf32> to vector<16x32xf32>
    %147 = arith.subf %137, %146 : vector<16x32xf32>
    %148 = arith.mulf %147, %147 : vector<16x32xf32>
    %cst_63 = arith.constant dense<0.000000e+00> : vector<16xf32>
    %149 = vector.multi_reduction <add>, %148, %cst_63 [1] : vector<16x32xf32> to vector<16xf32>
    %150 = vector.shape_cast %149 : vector<16xf32> to vector<16x1xf32>
    %cst_64 = arith.constant 3.200000e+01 : f32
    %151 = vector.broadcast %cst_64 : f32 to vector<16x1xf32>
    %152 = arith.divf %150, %151 : vector<16x1xf32>
    %cst_65 = arith.constant 9.99999974E-6 : f32
    %153 = vector.broadcast %cst_65 : f32 to vector<16x1xf32>
    %154 = arith.addf %152, %153 : vector<16x1xf32>
    %155 = math.rsqrt %154 : vector<16x1xf32>
    %156 = vector.broadcast %155 : vector<16x1xf32> to vector<16x32xf32>
    %157 = arith.mulf %147, %156 : vector<16x32xf32>
    %158 = vector.shape_cast %139 : vector<32xf32> to vector<1x32xf32>
    %159 = vector.broadcast %158 : vector<1x32xf32> to vector<16x32xf32>
    %160 = arith.mulf %157, %159 : vector<16x32xf32>
    %161 = vector.shape_cast %141 : vector<32xf32> to vector<1x32xf32>
    %162 = vector.broadcast %161 : vector<1x32xf32> to vector<16x32xf32>
    %163 = arith.addf %160, %162 : vector<16x32xf32>
    %c0_66 = arith.constant 0 : index
    %c0_67 = arith.constant 0 : index
    %164 = vector.load %arg11[%c0_66, %c0_67] : memref<32x32xf32, #tpu.memory_space<vmem>>, vector<32x32xf32>
    %cst_68 = arith.constant dense<0.000000e+00> : vector<16x32xf32>
    %165 = tpu.matmul %163, %164, %cst_68 {dimension_numbers = #tpu.dot_dimension_numbers<[1], [0], [0], [1], [0, 0, 1, 1], [], []>} : vector<16x32xf32>, vector<32x32xf32>, vector<16x32xf32> -> vector<16x32xf32>
    %c0_69 = arith.constant 0 : index
    %c0_70 = arith.constant 0 : index
    %166 = vector.load %arg12[%c0_69, %c0_70] : memref<1x32xf32, #tpu.memory_space<vmem>>, vector<1x32xf32>
    %167 = vector.shape_cast %166 : vector<1x32xf32> to vector<32xf32>
    %168 = vector.shape_cast %167 : vector<32xf32> to vector<1x32xf32>
    %169 = vector.broadcast %168 : vector<1x32xf32> to vector<16x32xf32>
    %170 = arith.addf %165, %169 : vector<16x32xf32>
    %cst_71 = arith.constant 5.000000e-01 : f32
    %171 = vector.broadcast %cst_71 : f32 to vector<16x32xf32>
    %172 = arith.mulf %171, %170 : vector<16x32xf32>
    %cst_72 = arith.constant 4.471500e-02 : f32
    %173 = vector.broadcast %cst_72 : f32 to vector<16x32xf32>
    %174 = arith.mulf %173, %170 : vector<16x32xf32>
    %175 = arith.mulf %174, %170 : vector<16x32xf32>
    %176 = arith.mulf %175, %170 : vector<16x32xf32>
    %177 = arith.addf %170, %176 : vector<16x32xf32>
    %cst_73 = arith.constant 0.797884583 : f32
    %178 = vector.broadcast %cst_73 : f32 to vector<16x32xf32>
    %179 = arith.mulf %178, %177 : vector<16x32xf32>
    %180 = math.tanh %179 : vector<16x32xf32>
    %cst_74 = arith.constant 1.000000e+00 : f32
    %181 = vector.broadcast %cst_74 : f32 to vector<16x32xf32>
    %182 = arith.addf %181, %180 : vector<16x32xf32>
    %183 = arith.mulf %172, %182 : vector<16x32xf32>
    %c0_75 = arith.constant 0 : index
    %c0_76 = arith.constant 0 : index
    %184 = vector.load %arg13[%c0_75, %c0_76] : memref<32x32xf32, #tpu.memory_space<vmem>>, vector<32x32xf32>
    %cst_77 = arith.constant dense<0.000000e+00> : vector<16x32xf32>
    %185 = tpu.matmul %183, %184, %cst_77 {dimension_numbers = #tpu.dot_dimension_numbers<[1], [0], [0], [1], [0, 0, 1, 1], [], []>} : vector<16x32xf32>, vector<32x32xf32>, vector<16x32xf32> -> vector<16x32xf32>
    %c0_78 = arith.constant 0 : index
    %c0_79 = arith.constant 0 : index
    %186 = vector.load %arg14[%c0_78, %c0_79] : memref<1x32xf32, #tpu.memory_space<vmem>>, vector<1x32xf32>
    %187 = vector.shape_cast %186 : vector<1x32xf32> to vector<32xf32>
    %188 = vector.shape_cast %187 : vector<32xf32> to vector<1x32xf32>
    %189 = vector.broadcast %188 : vector<1x32xf32> to vector<16x32xf32>
    %190 = arith.addf %185, %189 : vector<16x32xf32>
    %191 = arith.addf %137, %190 : vector<16x32xf32>
    %192 = vector.shape_cast %191 : vector<16x32xf32> to vector<2x8x32xf32>
    %c0_80 = arith.constant 0 : index
    %c0_81 = arith.constant 0 : index
    %c0_82 = arith.constant 0 : index
    %193 = vector.load %arg15[%c0_80, %c0_81, %c0_82] : memref<2x8x32xf32, #tpu.memory_space<vmem>>, vector<2x8x32xf32>
    tpu.vector_store %arg15[%c0_80, %c0_81, %c0_82], %192 {strides = array<i32>} : memref<2x8x32xf32, #tpu.memory_space<vmem>>, vector<2x8x32xf32>,
    return
  }
  func.func @transform_0(%arg0: i32) -> (i32, i32, i32) {
    %c0_i32 = arith.constant 0 : i32
    %c0_i32_0 = arith.constant 0 : i32
    %c0_i32_1 = arith.constant 0 : i32
    return %arg0, %c0_i32, %c0_i32_0 : i32, i32, i32
  }
  func.func @transform_1(%arg0: i32) -> (i32, i32, i32) {
    %c0_i32 = arith.constant 0 : i32
    %c0_i32_0 = arith.constant 0 : i32
    %c0_i32_1 = arith.constant 0 : i32
    return %arg0, %c0_i32, %c0_i32_0 : i32, i32, i32
  }
  func.func @transform_2(%arg0: i32) -> (i32, i32) {
    %c0_i32 = arith.constant 0 : i32
    %c0_i32_0 = arith.constant 0 : i32
    %c0_i32_1 = arith.constant 0 : i32
    return %c0_i32, %c0_i32_0 : i32, i32
  }
  func.func @transform_3(%arg0: i32) -> (i32, i32) {
    %c0_i32 = arith.constant 0 : i32
    %c0_i32_0 = arith.constant 0 : i32
    %c0_i32_1 = arith.constant 0 : i32
    return %c0_i32, %c0_i32_0 : i32, i32
  }
  func.func @transform_4(%arg0: i32) -> (i32, i32) {
    %c0_i32 = arith.constant 0 : i32
    %c0_i32_0 = arith.constant 0 : i32
    %c0_i32_1 = arith.constant 0 : i32
    return %c0_i32, %c0_i32_0 : i32, i32
  }
  func.func @transform_5(%arg0: i32) -> (i32, i32) {
    %c0_i32 = arith.constant 0 : i32
    %c0_i32_0 = arith.constant 0 : i32
    %c0_i32_1 = arith.constant 0 : i32
    return %c0_i32, %c0_i32_0 : i32, i32
  }
  func.func @transform_6(%arg0: i32) -> (i32, i32) {
    %c0_i32 = arith.constant 0 : i32
    %c0_i32_0 = arith.constant 0 : i32
    %c0_i32_1 = arith.constant 0 : i32
    return %c0_i32, %c0_i32_0 : i32, i32
  }
  func.func @transform_7(%arg0: i32) -> (i32, i32) {
    %c0_i32 = arith.constant 0 : i32
    %c0_i32_0 = arith.constant 0 : i32
    %c0_i32_1 = arith.constant 0 : i32
    return %c0_i32, %c0_i32_0 : i32, i32
  }
  func.func @transform_8(%arg0: i32) -> (i32, i32) {
    %c0_i32 = arith.constant 0 : i32
    %c0_i32_0 = arith.constant 0 : i32
    %c0_i32_1 = arith.constant 0 : i32
    return %c0_i32, %c0_i32_0 : i32, i32
  }
  func.func @transform_9(%arg0: i32) -> (i32, i32) {
    %c0_i32 = arith.constant 0 : i32
    %c0_i32_0 = arith.constant 0 : i32
    %c0_i32_1 = arith.constant 0 : i32
    return %c0_i32, %c0_i32_0 : i32, i32
  }
  func.func @transform_10(%arg0: i32) -> (i32, i32) {
    %c0_i32 = arith.constant 0 : i32
    %c0_i32_0 = arith.constant 0 : i32
    %c0_i32_1 = arith.constant 0 : i32
    return %c0_i32, %c0_i32_0 : i32, i32
  }
  func.func @transform_11(%arg0: i32) -> (i32, i32) {
    %c0_i32 = arith.constant 0 : i32
    %c0_i32_0 = arith.constant 0 : i32
    %c0_i32_1 = arith.constant 0 : i32
    return %c0_i32, %c0_i32_0 : i32, i32
  }
  func.func @transform_12(%arg0: i32) -> (i32, i32) {
    %c0_i32 = arith.constant 0 : i32
    %c0_i32_0 = arith.constant 0 : i32
    %c0_i32_1 = arith.constant 0 : i32
    return %c0_i32, %c0_i32_0 : i32, i32
  }
  func.func @transform_13(%arg0: i32) -> (i32, i32) {
    %c0_i32 = arith.constant 0 : i32
    %c0_i32_0 = arith.constant 0 : i32
    %c0_i32_1 = arith.constant 0 : i32
    return %c0_i32, %c0_i32_0 : i32, i32
  }
  func.func @transform_14(%arg0: i32) -> (i32, i32, i32) {
    %c0_i32 = arith.constant 0 : i32
    %c0_i32_0 = arith.constant 0 : i32
    %c0_i32_1 = arith.constant 0 : i32
    return %arg0, %c0_i32, %c0_i32_0 : i32, i32, i32
  }
}

</mosaic_0001>

<bundles_post_ra>
// kernel: tpu_custom_call.1
= control target key start
LH: loop header
LB: loop body
LE: loop exit
PB: predicated region body
PF: predicated region fallthrough
CT: control target
= control target key end

     0   :  { %s3973_s0 = inlined_call_operand.hbm [shape: f32[4,8,32], index: 0, kind: input, shape index: {}]   ;;  %s3974_s1 = inlined_call_operand.hbm [shape: f32[4,1,8], index: 1, kind: input, shape index: {}]   ;;  %s3975_s2 = inlined_call_operand.vmem [shape: f32[1,32], index: 2, kind: input, shape index: {}]   ;;  %s3976_s3 = inlined_call_operand.vmem [shape: f32[1,32], index: 3, kind: input, shape index: {}]   ;;  %s3977_s4 = inlined_call_operand.hbm [shape: f32[32,96], index: 4, kind: input, shape index: {}]   ;;  %s3978_s5 = inlined_call_operand.vmem [shape: f32[1,96], index: 5, kind: input, shape index: {}]   ;;  %s3979_s6 = inlined_call_operand.hbm [shape: f32[32,32], index: 6, kind: input, shape index: {}]   ;;  %s3980_s7 = inlined_call_operand.vmem [shape: f32[1,32], index: 7, kind: input, shape index: {}]   ;;  %s3981_s8 = inlined_call_operand.vmem [shape: f32[1,32], index: 8, kind: input, shape index: {}]   ;;  %s3982_s9 = inlined_call_operand.hbm [shape: f32[1,32], index: 9, kind: input, shape index: {}]   ;;  %s3983_s10 = inlined_call_operand.vmem [shape: f32[32,32], index: 10, kind: input, shape index: {}]   ;;  %s3984_s11 = inlined_call_operand.vmem [shape: f32[1,32], index: 11, kind: input, shape index: {}]   ;;  %s3985_s12 = inlined_call_operand.hbm [shape: f32[32,32], index: 12, kind: input, shape index: {}]   ;;  %s3986_s13 = inlined_call_operand.vmem [shape: f32[1,32], index: 13, kind: input, shape index: {}]   ;;  %s3987_s14 = inlined_call_operand.hbm [shape: f32[4,8,32], index: 14, kind: output, shape index: {}]  }
   0x1   :  { %3997 = sst [smem:[#allocation23_spill]] %s3973_s0 }
   0x2   :  { %3998 = sst [smem:[#allocation24_spill]] %s3977_s4 }
   0x3   :  { %3999 = sst [smem:[#allocation25_spill]] %s3979_s6 }
   0x4   :  { %4000 = sst [smem:[#allocation26_spill]] %s3980_s7 }
   0x5   :  { %4001 = sst [smem:[#allocation27_spill]] %s3981_s8 }
   0x6   :  { %4002 = sst [smem:[#allocation28_spill]] %s3982_s9 }
   0x7   :  { %4003 = sst [smem:[#allocation29_spill]] %s3983_s10 }
   0x8   :  { %4004 = sst [smem:[#allocation30_spill]] %s3984_s11 }
   0x9   :  { %4005 = sst [smem:[#allocation31_spill]] %s3986_s13 }
   0xa   :  { %4006 = sst [smem:[#allocation32_spill]] %s3987_s14 }
   0xb   :  { %19 = vsyncpa [#allocation4], 0 }
   0xc   :  { %21 = vsyncpa [#allocation4 + $0x1], 0 }
   0xd   :  { %22 = vsyncpa [#allocation7], 0 }
   0xe   :  { %24 = vsyncpa [#allocation7 + $0x1], 0 }
   0xf   :  { %25 = vsyncpa [#allocation10], 0 }
  0x10   :  { %26 = vsyncpa [#allocation13], 0 }
  0x11   :  { %27 = vsyncpa [#allocation5], 0 }
  0x12   :  { %29 = vsyncpa [#allocation5 + $0x1], 0  ;;  %s3410_s29 = smov 0   ;;  %s3412_s30 = smov 0  }
  0x13   :  { %s3414_s15 = smov 0   ;;  %s3416_s16 = smov 0  }
  0x14 LB: > { %4007 = sst [smem:[#allocation21_spill]] %s3293_s29  ;;  %s3431_s17 = sadd.s32 4294967295, %s3305_s16   ;;  %s3305_s16 = sphi %s3416_s16, %s4045_s16   ;;  %s3301_s15 = sphi %s3414_s15, %s4044_s15   ;;  %s3297_s30 = sphi %s3412_s30, %s4043_s30   ;;  %s3293_s29 = sphi %s3410_s29, %s4042_s29  }
  0x15   : > { %s2611_s18 = sadd.s32 4294967294, %s3305_s16   ;;  %p55_p0 = scmp.ne.s32.totalorder %s3297_s30, %s3293_s29 }
  0x16   : > { %p3991_p1 = scmp.eq.s32.totalorder %s3431_s17, 0  ;;  %p363_p3 = scmp.eq.s32.totalorder %s2611_s18, 1 }
  0x17   : > { %p2612_p5 = scmp.ge.s32.totalorder %s3305_s16, 1  ;;  %p370_p7 = scmp.lt.s32.totalorder %s3305_s16, 3 }
  0x18   : > { %p3440_p4 = por %p3991_p1, %p55_p0  ;;  %p3445_p6 = por %p363_p3, %p55_p0 }
  0x19   : > { %p3450_p8 = pnand %p2612_p5, %p370_p7  ;;  %s3307_s22 = smov [#allocation8]  }
  0x1a   : > { %s4008_s19 = scalar_select %p3440_p4, 1, 0 }
  0x1b   : > { %s4009_s20 = scalar_select %p3445_p6, 1, 0 }
  0x1c   : > { %s4011_s21 = scalar_select %p3450_p8, 1, 0 }
  0x1d   : > { %4010 = sst [smem:[#allocation22_spill]] %s4009_s20  ;;  %s388_s23 = sshll.u32 %s3307_s22, 4  ;;  %s3454_s23 = int_to_ptr.vmem [resolvable:$true] %s388_s23 }
  0x1e   : > { %p2916_p9 = pneg %p3450_p8  ;;  %s3308_s25 = smov [#allocation9]  }
  0x1f   : > { %s404_s26 = sshll.u32 %s3308_s25, 4  ;;  %s3309_s27 = smov [#allocation11]   ;;  %s3465_s26 = int_to_ptr.vmem [resolvable:$true] %s404_s26 }
  0x20   : > { %p3461_p11 = pnand %p2916_p9, %p3991_p1  ;;  %s3467_s28 = sshll.u32 %s3309_s27, 4  ;;  %s425_s28 = int_to_ptr.vmem [resolvable:$true] %s3467_s28 }
  0x21   : > { %s4013_s4 = sld [smem:[#allocation24_spill]] }
  0x22   : > { %p3477_p13 = pneg %p3461_p11 }
  0x27   : > { %s3051_s20 = scalar_lea.hbm %s4013_s4, 512 }
  0x28   : > { %p3052_p12 = scmp.ne.s32.totalorder %s4013_s4, %s3051_s20  ;;  %p3058_p5 = scmp.lt.u32.totalorder %s3051_s20, %s4013_s4 }
  0x2a   : > { %p3054_p0 = pnand %p3477_p13, %p3052_p12 }
  0x2c   : > { %p3055_p3 = pneg %p3054_p0 }
  0x2e   : > { %p3060_p7 = pnand %p3058_p5, %p3055_p3 }
  0x30   : > { %3063 = shalt.err (!%p3060_p7)
}
  0x31   : > { %s3064_s14 = scalar_lea.vmem %s3454_s23, 512  ;;  %p3072_p2 = scmp.lt.s32.totalorder %s3454_s23, %s3454_s23 }
  0x32   : > { %p3065_p9 = scmp.ne.s32.totalorder %s3454_s23, %s3064_s14  ;;  %p3073_p6 = scmp.lt.s32.totalorder %s3064_s14, %s3064_s14 }
  0x34   : > { %p3067_p10 = pnand %p3065_p9, %p3477_p13  ;;  %p3074_p12 = por %p3073_p6, %p3072_p2 }
  0x36   : > { %p3068_p1 = pneg %p3067_p10 }
  0x38   : > { %p3075_p0 = pnand %p3074_p12, %p3068_p1 }
  0x3a   : > { %3078 = shalt.err (!%p3075_p0)
}
  0x3b   : > { %s3995_s29 = smov 128   ;;  %s3996_s20 = smov 8  }
  0x3c   : > { %2919 = dma.hbm_to_vmem [thread:$0]  (!%p3461_p11), %s4013_s4, 512, %s3454_s23, [#allocation7], %s3995_s29, %s3995_s29, %s3996_s20  }
  0x3d   : > { %s4015_s6 = sld [smem:[#allocation25_spill]] }
  0x43   : > { %s3079_s14 = scalar_lea.hbm %s4015_s6, 512 }
  0x44   : > { %p3080_p1 = scmp.ne.s32.totalorder %s4015_s6, %s3079_s14  ;;  %p3086_p10 = scmp.lt.u32.totalorder %s3079_s14, %s4015_s6 }
  0x46   : > { %p3082_p2 = pnand %p3080_p1, %p3477_p13 }
  0x48   : > { %p3083_p6 = pneg %p3082_p2 }
  0x4a   : > { %p3088_p3 = pnand %p3086_p10, %p3083_p6 }
  0x4c   : > { %3091 = shalt.err (!%p3088_p3)
}
  0x4d   : > { %s3092_s23 = scalar_lea.vmem %s3465_s26, 512  ;;  %p3100_p12 = scmp.lt.s32.totalorder %s3465_s26, %s3465_s26 }
  0x4e   : > { %p3093_p5 = scmp.ne.s32.totalorder %s3465_s26, %s3092_s23  ;;  %p3101_p0 = scmp.lt.s32.totalorder %s3092_s23, %s3092_s23 }
  0x50   : > { %p3095_p7 = pnand %p3093_p5, %p3477_p13  ;;  %p3102_p1 = por %p3101_p0, %p3100_p12 }
  0x52   : > { %p3096_p9 = pneg %p3095_p7 }
  0x54   : > { %p3103_p2 = pnand %p3102_p1, %p3096_p9 }
  0x56   : > { %3106 = shalt.err (!%p3103_p2)
}
  0x57   : > { %2922 = dma.hbm_to_vmem [thread:$0]  (!%p3461_p11), %s4015_s6, 512, %s3465_s26, [#allocation10], %s3995_s29, %s3995_s29, %s3996_s20  }
  0x58   : > { %s4016_s9 = sld [smem:[#allocation28_spill]] }
  0x5e   : > { %s3107_s18 = scalar_lea.hbm %s4016_s9, 16 }
  0x5f   : > { %p3108_p6 = scmp.ne.s32.totalorder %s4016_s9, %s3107_s18  ;;  %p3114_p5 = scmp.lt.u32.totalorder %s3107_s18, %s4016_s9 }
  0x61   : > { %p3110_p10 = pnand %p3108_p6, %p3477_p13 }
  0x63   : > { %p3111_p3 = pneg %p3110_p10 }
  0x65   : > { %p3116_p7 = pnand %p3114_p5, %p3111_p3 }
  0x67   : > { %3119 = shalt.err (!%p3116_p7)
}
  0x68   : > { %s3120_s23 = scalar_lea.vmem %s425_s28, 16  ;;  %s3127_s26 = scalar_lea.vmem %s425_s28, 32 }
  0x69   : > { %p3121_p9 = scmp.ne.s32.totalorder %s425_s28, %s3120_s23  ;;  %p3128_p1 = scmp.lt.s32.totalorder %s425_s28, %s425_s28 }
  0x6a   : > { %p3129_p2 = scmp.lt.s32.totalorder %s3127_s26, %s3120_s23 }
  0x6b   : > { %p3123_p12 = pnand %p3121_p9, %p3477_p13 }
  0x6c   : > { %p3130_p4 = por %p3129_p2, %p3128_p1 }
  0x6d   : > { %p3124_p0 = pneg %p3123_p12 }
  0x6f   : > { %p3131_p8 = pnand %p3130_p4, %p3124_p0 }
  0x71   : > { %3134 = shalt.err (!%p3131_p8)
}
  0x72   : > { %2925 = dma.hbm_to_vmem [thread:$0]  (!%p3461_p11), %s4016_s9, 16, %s425_s28, [#allocation10]  }
  0x73   : > { %s3312_s10 = smov [#allocation12]   ;;  %s3135_s25 = scalar_lea.hbm %s3985_s12, 512 }
  0x74   : > { %s440_s11 = sshll.u32 %s3312_s10, 4  ;;  %p3136_p6 = scmp.ne.s32.totalorder %s3985_s12, %s3135_s25  ;;  %s441_s11 = int_to_ptr.vmem [resolvable:$true] %s440_s11 }
  0x75   : > { %p3142_p10 = scmp.lt.u32.totalorder %s3135_s25, %s3985_s12 }
  0x76   : > { %p3138_p4 = pnand %p3136_p6, %p3477_p13 }
  0x78   : > { %p3139_p8 = pneg %p3138_p4 }
  0x7a   : > { %p3144_p3 = pnand %p3142_p10, %p3139_p8 }
  0x7c   : > { %3147 = shalt.err (!%p3144_p3)
}
  0x7d   : > { %s3148_s28 = scalar_lea.vmem %s441_s11, 512  ;;  %p3156_p12 = scmp.lt.s32.totalorder %s441_s11, %s441_s11 }
  0x7e   : > { %p3149_p5 = scmp.ne.s32.totalorder %s441_s11, %s3148_s28  ;;  %p3157_p0 = scmp.lt.s32.totalorder %s3148_s28, %s3148_s28 }
  0x80   : > { %p3151_p7 = pnand %p3149_p5, %p3477_p13  ;;  %p3158_p1 = por %p3157_p0, %p3156_p12 }
  0x82   : > { %p3152_p9 = pneg %p3151_p7 }
  0x84   : > { %p3159_p2 = pnand %p3158_p1, %p3152_p9 }
  0x86   : > { %3162 = shalt.err (!%p3159_p2)
}
  0x87   : > { %2928 = dma.hbm_to_vmem [thread:$0]  (!%p3461_p11), %s3985_s12, 512, %s441_s11, [#allocation13], %s3995_s29, %s3995_s29, %s3996_s20  }
  0x88   : > { %s3568_s13 = sadd.s32 1, %s3305_s16   ;;  %s42_s24 = sadd.s32 1, %s3301_s15 }
  0x89   : > { %s39_s10 = ssub.s32 %s3305_s16, %s3568_s13  ;;  %p49_p13 = scmp.ne.s32.totalorder %s3301_s15, %s3297_s30 }
  0x8a   : > { %p40_p6 = scmp.eq.s32.totalorder %s39_s10, 0  ;;  %p50_p4 = scmp.eq.s32.totalorder %s3305_s16, 0 }
  0x8b   : > { %p4017_p8 = scmp.eq.s32.totalorder %s3431_s17, 1  ;;  %p2944_p3 = scmp.lt.s32.totalorder %s3305_s16, 2 }
  0x8c   : > { %s3584_s22 = scalar_select %p40_p6, %s3301_s15, %s42_s24  }
  0x8d   : > { %p3578_p10 = por %p4017_p8, %p49_p13  ;;  %p51_p5 = por %p50_p4, %p49_p13 }
  0x8e   : > { %s3587_s25 = sand.u32 1, %s3301_s15   ;;  %s2679_s27 = sshll.u32 %s3305_s16, 8 }
  0x8f   : > { %s2618_s11 = sshll.u32 %s3587_s25, 4  ;;  %s4019_s0 = sld [smem:[#allocation23_spill]] }
  0x90   : > { %s461_s28 = scalar_lea.vmem [#allocation3], %s2618_s11  ;;  %p3598_p11 = pnand %p2944_p3, %p51_p5 }
  0x91   : > { %s468_s7 = sshll.u32 %s461_s28, 4  ;;  %s2621_s10 = sshll.u32 %s3587_s25, 1  ;;  %s3596_s7 = int_to_ptr.vmem [resolvable:$true] %s468_s7 }
  0x92   : > { %s458_s29 = scalar_lea.sflag [#allocation4], %s3587_s25  ;;  %p3165_p9 = pneg %p3598_p11 }
  0x95   : > { %s3594_s26 = scalar_lea.hbm %s4019_s0, %s2679_s27  ;;  %s3168_s23 = scalar_lea.hbm %s4019_s0, 512 }
  0x96   : > { %s3163_s14 = scalar_lea.hbm %s3594_s26, 256  ;;  %p3169_p1 = scmp.lt.u32.totalorder %s3594_s26, %s4019_s0 }
  0x97   : > { %p3164_p7 = scmp.ne.s32.totalorder %s3594_s26, %s3163_s14  ;;  %p3170_p2 = scmp.lt.u32.totalorder %s3168_s23, %s3163_s14 }
  0x98   : > { %p3172_p6 = scmp.lt.u32.totalorder %s3163_s14, %s3594_s26 }
  0x99   : > { %p3166_p12 = pnand %p3165_p9, %p3164_p7  ;;  %p3171_p13 = por %p3170_p2, %p3169_p1 }
  0x9b   : > { %p3167_p0 = pneg %p3166_p12  ;;  %p3173_p4 = por %p3172_p6, %p3171_p13 }
  0x9d   : > { %p3174_p8 = pnand %p3173_p4, %p3167_p0 }
  0x9f   : > { %3177 = shalt.err (!%p3174_p8)
}
  0xa0   : > { %s3178_s24 = scalar_lea.vmem %s3596_s7, 256  ;;  %s3313_s11 = smov [#allocation3]  }
  0xa1   : > { %p3179_p3 = scmp.ne.s32.totalorder %s3596_s7, %s3178_s24  ;;  %s3183_s27 = sshll.u32 %s3313_s11, 4  ;;  %s3184_s27 = int_to_ptr.vmem [resolvable:$false] %s3183_s27 }
  0xa2   : > { %s3185_s20 = scalar_lea.vmem %s3184_s27, 512  ;;  %p3186_p12 = scmp.lt.s32.totalorder %s3596_s7, %s3184_s27 }
  0xa3   : > { %p3181_p5 = pnand %p3179_p3, %p3165_p9  ;;  %p3187_p1 = scmp.lt.s32.totalorder %s3185_s20, %s3178_s24 }
  0xa5   : > { %p3182_p7 = pneg %p3181_p5  ;;  %p3188_p2 = por %p3187_p1, %p3186_p12 }
  0xa7   : > { %p3189_p13 = pnand %p3188_p2, %p3182_p7 }
  0xa9   : > { %3192 = shalt.err (!%p3189_p13)
}
  0xaa   : > { %s4021_s14 = smov 8   ;;  %s4022_s23 = smov 128  }
  0xab   : > { %2932 = dma.hbm_to_vmem [thread:$0]  (!%p3598_p11), %s3594_s26, 256, %s3596_s7, %s458_s29, %s4022_s23, %s4022_s23, %s4021_s14  }
  0xac   : > { %s2680_s28 = sshll.u32 %s3305_s16, 5  ;;  %s482_s20 = scalar_lea.vmem [#allocation6], %s2621_s10 }
  0xad   : > { %s3639_s27 = scalar_lea.hbm %s3974_s1, %s2680_s28  ;;  %s489_s0 = sshll.u32 %s482_s20, 4  ;;  %s3643_s0 = int_to_ptr.vmem [resolvable:$true] %s489_s0 }
  0xae   : > { %s4023_s4 = sand.u32 1, %s3305_s16   ;;  %s3193_s9 = scalar_lea.hbm %s3639_s27, 32 }
  0xaf   : > { %s3647_s6 = scalar_lea.sflag [#allocation7], %s4023_s4  ;;  %p3194_p0 = scmp.ne.s32.totalorder %s3639_s27, %s3193_s9 }
  0xb0   : > { %s3198_s25 = scalar_lea.hbm %s3974_s1, 64  ;;  %p3199_p8 = scmp.lt.u32.totalorder %s3639_s27, %s3974_s1 }
  0xb1   : > { %p3196_p6 = pnand %p3194_p0, %p3165_p9  ;;  %p3200_p3 = scmp.lt.u32.totalorder %s3198_s25, %s3193_s9 }
  0xb2   : > { %p3202_p7 = scmp.lt.u32.totalorder %s3193_s9, %s3639_s27 }
  0xb3   : > { %p3197_p4 = pneg %p3196_p6  ;;  %p3201_p5 = por %p3200_p3, %p3199_p8 }
  0xb5   : > { %p3203_p12 = por %p3202_p7, %p3201_p5 }
  0xb7   : > { %p3204_p1 = pnand %p3203_p12, %p3197_p4 }
  0xb9   : > { %3207 = shalt.err (!%p3204_p1)
}
  0xba   : > { %s3208_s4 = scalar_lea.vmem %s3643_s0, 32  ;;  %s3314_s10 = smov [#allocation6]  }
  0xbb   : > { %p3209_p2 = scmp.ne.s32.totalorder %s3643_s0, %s3208_s4  ;;  %s3213_s23 = sshll.u32 %s3314_s10, 4  ;;  %s3214_s23 = int_to_ptr.vmem [resolvable:$false] %s3213_s23 }
  0xbc   : > { %s3215_s28 = scalar_lea.vmem %s3214_s23, 64  ;;  %p3216_p6 = scmp.lt.s32.totalorder %s3643_s0, %s3214_s23 }
  0xbd   : > { %p3211_p13 = pnand %p3209_p2, %p3165_p9  ;;  %p3217_p8 = scmp.lt.s32.totalorder %s3215_s28, %s3208_s4 }
  0xbf   : > { %p3212_p0 = pneg %p3211_p13  ;;  %p3218_p3 = por %p3217_p8, %p3216_p6 }
  0xc1   : > { %p3219_p5 = pnand %p3218_p3, %p3212_p0 }
  0xc3   : > { %3222 = shalt.err (!%p3219_p5)
}
  0xc4   : > { %s3315_s9 = smov 16   ;;  %s3316_s11 = smov 1  }
  0xc5   : > { %2935 = dma.hbm_to_vmem [thread:$0]  (!%p3598_p11), %s3639_s27, 32, %s3643_s0, %s3647_s6, %s3315_s9, %s3315_s9, %s3316_s11  }
  0xc6   : > { %p4024_p9 = scmp.ne.s32.totalorder %s4011_s21, 0 }
  0xc7   : > { %s3676_s24 = sand.u32 (!%p4024_p9), 1, %s3297_s30   ;;  %p4025_p4 = scmp.ne.s32.totalorder (!%p4024_p9), %s4008_s19, 0 }
  0xc8   : > { %501 = sbr.rel (%p4024_p9) target bundleno = 4430 (0x114e), region = 76  ;;  %s2625_s20 = sshll.u32 (!%p4024_p9), %s3676_s24, 4 }
  0xc9   : > { %s504_s29 = scalar_lea.sflag (!%p4024_p9), [#allocation4], %s3676_s24  ;;  %s507_s26 = scalar_lea.vmem (!%p4024_p9), [#allocation3], %s2625_s20 }
  0xcf   : > { %3268 = dma.done.wait (%p4025_p4), %s504_s29, 256  }
  0xd0   : > { %3270 = vsyncadd (%p4025_p4), %s504_s29, 4294967040  ;;  %s512_s0 = sand.u32 1, %s3431_s17   ;;  %s2626_s6 = sshll.u32 %s3676_s24, 1 }
  0xd1   : > { %s513_s21 = scalar_lea.sflag [#allocation7], %s512_s0  ;;  %s3688_s8 = scalar_lea.vmem [#allocation6], %s2626_s6 }
  0xd2   : > { %3272 = dma.done.wait (%p4025_p4), %s513_s21, 32  }
  0xd3   : > { %3274 = vsyncadd (%p4025_p4), %s513_s21, 4294967264  ;;  %p4026_p11 = scmp.eq.s32.totalorder %s3431_s17, 0 }
  0xd5   : > { %3276 = dma.done.wait (%p4026_p11), [#allocation7], 512   ;;  %p4027_p7 = pmov %p4026_p11 }
  0xd7   : > { %3278 = vsyncadd (%p4027_p7), [#allocation7], 4294966784  ;;  %p4028_p12 = pmov %p4027_p7 }
  0xd8   : > { %p4029_p1 = pmov %p4027_p7 }
  0xd9   : > { %3280 = dma.done.wait (%p4028_p12), [#allocation10], 528  }
  0xda   : > { %3282 = vsyncadd (%p4029_p1), [#allocation10], 4294966768  ;;  %p4030_p2 = pmov %p4029_p1 }
  0xdb   : > { %p4031_p13 = pmov %p4029_p1 }
  0xdc   : > { %3284 = dma.done.wait (%p4030_p2), [#allocation13], 512  }
  0xdd   : > { %3286 = vsyncadd (%p4031_p13), [#allocation13], 4294966784  ;;  %vm589_vm0 = vcmask 261120   ;;  %v585_v0 = vld [vmem:[%s507_s26] sm:$0xff]  ;;  %v586_v1 = vld [vmem:[%s507_s26 + $0x8] sm:$0xff]  ;;  %v3317_v36 = vmov 0.0   ;;  %v725_v44 = vlaneseq }
  0xde   : > { %v590_v2 = vsel %vm589_vm0, %v585_v0, 0.0  ;;  %v593_v3 = vsel %vm589_vm0, %v586_v1, 0.0  ;;  %v633_v14 = vld [vmem:[#allocation8] sm:$0xff]  ;;  %v634_v15 = vld [vmem:[#allocation8 + $0x8] sm:$0xff]  ;;  %v635_v16 = vld [vmem:[#allocation8 + $0x10] sm:$0xff]  ;;  %2749 = vmatprep.subr.mxu1 %v3317_v36  ;;  %vm3318_vm1 = vmmov 0  }
  0xdf   : > { %591 = vadd.xlane.f32.xlu0 %v590_v2  ;;  %v2862_v17 = vpack.c.bf16 %v634_v15, %v633_v14  ;;  %v636_v18 = vld [vmem:[#allocation8 + $0x18] sm:$0xff]  ;;  %v2632_v27 = vld [vmem:[%s3975_s2] ss:$0 sm:$0xff]  ;;  %2751 = vmatprep.mubr.msk.f32.mxu1 %vm3318_vm1, %v3317_v36  ;;  %s3319_s10 = smov 96   ;;  %vm750_vm2 = vcmask 64512   ;;  %v726_v45 = vshrl.u32 %v725_v44, 7 }
  0xe0   : > { %v2866_v19 = vpack.c.bf16 %v636_v18, %v635_v16  ;;  %v2633_v29 = vld [vmem:[%s3976_s3] ss:$0 sm:$0xff]  ;;  %v728_v46 = vand.u32 127, %v725_v44  ;;  %v2637_v48 = vld [vmem:[%s3688_s8] ss:$0 sm:$0xff]  ;;  %s3320_s23 = smov 64  }
  0xe1   : > { %2863 = vmatprep.subr.bf16.mxu0 %v2862_v17  ;;  %v2634_v37 = vld [vmem:[%s3978_s5] ss:$0 sm:$0xff]  ;;  %v2638_v51 = vld [vmem:[%s3688_s8 + $0x1] ss:$0 sm:$0xff]  ;;  %s3321_s28 = smov 88   ;;  %s3322_s9 = smov 120  }
  0xe2   : > { %2865 = vmatpush3.bf16.msra.mxu0 %v2862_v17  ;;  %vm729_vm3 = vcmp.gt.s32.totalorder %v728_v46, %v726_v45  ;;  %s3323_s11 = smov 56   ;;  %s3324_s29 = smov 80   ;;  %vm1424_vm4 = vcmask 130112   ;;  %vm1769_vm5 = vcmask 195712   ;;  %vm2114_vm6 = vcmask 261312  }
  0xe3   : > { %594 = vadd.xlane.f32.xlu0 %v593_v3  ;;  %2867 = vmatprep.subr.bf16.mxu0 %v2866_v19  ;;  %v730_v47 = vsel %vm729_vm3, -1e+30, %v3317_v36  ;;  %s3325_s26 = smov 112   ;;  %s3326_s0 = smov 48  }
  0xe4   : > { %v3753_v49 = vadd.f32 %v2637_v48, %v730_v47  ;;  %v3757_v55 = vadd.f32 %v2638_v51, %v730_v47  ;;  %s3327_s6 = smov 72   ;;  %s3328_s21 = smov 104  }
  0xe5   : > { %s3329_s8 = smov 40   ;;  %s3330_s19 = smov 8  }
  0xe6   : > { %2869 = vmatpush3.bf16.msra.mxu0 %v2866_v19  ;;  %s3331_s27 = smov 16   ;;  %s3332_s25 = smov 24  }
  0xe7   : > { %2769 = vmatprep.subr.mxu0 %v3317_v36  ;;  %s4032_s4 = sld [smem:[#allocation26_spill]]  ;;  %s4035_s14 = sld [smem:[#allocation30_spill]] }
 0x16c   : > { %v592_v4 = vpop.xlane.xlu0 %591 }
 0x16d   : > { %v597_v5 = vmul.f32 0.03125, %v592_v4 }
 0x16f   : > { %v599_v6 = vsub.f32 %v585_v0, %v597_v5 }
 0x170   : > { %v595_v7 = vpop.xlane.xlu0 %594 }
 0x171   : > { %v598_v8 = vmul.f32 0.03125, %v595_v7  ;;  %v601_v9 = vmul.f32 %v599_v6, %v599_v6 }
 0x173   : > { %v600_v10 = vsub.f32 %v586_v1, %v598_v8  ;;  %v603_v11 = vsel %vm589_vm0, %v601_v9, 0.0 }
 0x174   : > { %604 = vadd.xlane.f32.xlu1 %v603_v11 }
 0x175   : > { %v602_v12 = vmul.f32 %v600_v10, %v600_v10 }
 0x177   : > { %v606_v13 = vsel %vm589_vm0, %v602_v12, 0.0 }
 0x178   : > { %607 = vadd.xlane.f32.xlu1 %v606_v13 }
 0x201   : > { %v605_v20 = vpop.xlane.xlu1 %604 }
 0x202   : > { %v609_v21 = vmul.f32 0.03125, %v605_v20 }
 0x204   : > { %v611_v22 = vadd.f32 1e-05, %v609_v21 }
 0x205   : > { %v608_v23 = vpop.xlane.xlu1 %607 }
 0x206   : > { %3007 = vrsqrt.f32 %v611_v22  ;;  %v610_v24 = vmul.f32 0.03125, %v608_v23 }
 0x208   : > { %v612_v25 = vadd.f32 1e-05, %v610_v24 }
 0x20a   : > { %3009 = vrsqrt.f32 %v612_v25 }
 0x210   : > { %v3008_v26 = vpop.eup %3007 }
 0x211   : > { %v615_v28 = vmul.f32 %v3008_v26, %v599_v6 }
 0x213   : > { %v623_v30 = vmul.f32 %v2632_v27, %v615_v28 }
 0x214   : > { %v3010_v31 = vpop.eup %3009 }
 0x215   : > { %v616_v32 = vmul.f32 %v3010_v31, %v600_v10  ;;  %v3716_v33 = vadd.f32 %v2633_v29, %v623_v30 }
 0x217   : > { %v624_v34 = vmul.f32 %v2632_v27, %v616_v32  ;;  %2746 = vmatprep.mubr.msk.f32.mxu0 %vm589_vm0, %v3716_v33 }
 0x219   : > { %v3720_v35 = vadd.f32 %v2633_v29, %v624_v34 }
 0x21b   : > { %2747 = vmatmul.mubr.msk.f32.vlgmr.msra.gmra.mrb[0].mxu0 %vm589_vm0, %v3720_v35 }
 0x21c   : > { %2771 = vmatprep.mubr.msk.f32.mxu0 %vm3318_vm1, %v3317_v36 }
 0x2ee   : > { %v2748_v38 = vpop.f32.mrb[0].mxu0 }
 0x2ef   : > { %v3733_v39 = vadd.f32 %v2748_v38, %v2634_v37  ;;  %v716_v40 = vpop.f32.mrb[1].mxu0 }
 0x2f0   : > { %v3735_v41 = vadd.f32 %v2634_v37, %v716_v40 }
 0x2f1   : > { %826 = vrot.lane.b32.xlu1 %v3733_v39, %s3319_s10 }
 0x2f2   : > { %748 = vrot.lane.b32.xlu0 %v3735_v41, %s3319_s10 }
 0x363   : > { %v827_v43 = vpop.permute.xlu1 %826 }
 0x364   : > { %v749_v42 = vpop.permute.xlu0 %748 }
 0x365   : > { %2750 = vmatpush3.xpose.msk.msra.mxu1 %vm750_vm2, %v749_v42 }
 0x366   : > { %2754 = vmatprep.subr.mxu1 %v3317_v36 }
 0x368   : > { %2752 = vmatmul.mubr.msk.f32.vlgmr.msra.gmra.mrb[0].mxu1 %vm750_vm2, %v3735_v41 }
 0x369   : > { %2755 = vmatpush3.xpose.msk.msra.mxu1 %vm750_vm2, %v827_v43  ;;  %2756 = vmatprep.mubr.msk.f32.mxu1 %vm3318_vm1, %v3317_v36 }
 0x36a   : > { %2759 = vmatprep.subr.mxu1 %v3317_v36 }
 0x36c   : > { %2757 = vmatmul.mubr.msk.f32.vlgmr.msra.gmra.mrb[2].mxu1 %vm750_vm2, %v3733_v39 }
 0x36d   : > { %2761 = vmatprep.mubr.msk.f32.mxu1 %vm3318_vm1, %v3317_v36 }
 0x43b   : > { %v821_v50 = vpop.f32.mrb[0].mxu1 }
 0x43c   : > { %v902_v52 = vmul.f32 0.35355338, %v821_v50  ;;  %v2753_v53 = vpop.f32.mrb[1].mxu1 }
 0x43e   : > { %v904_v54 = vadd.f32 %v902_v52, %v3753_v49 }
 0x43f   : > { %v898_v56 = vpop.f32.mrb[2].mxu1 }
 0x440   : > { %v903_v57 = vmul.f32 0.35355338, %v898_v56  ;;  %v2758_v58 = vpop.f32.mrb[3].mxu1  ;;  %v906_v59 = vsel %vm750_vm2, %v904_v54, -inf }
 0x441   : > { %907 = vmax.xlane.f32.xlu1 %v906_v59 }
 0x442   : > { %v905_v60 = vadd.f32 %v903_v57, %v3757_v55 }
 0x444   : > { %v909_v61 = vsel %vm750_vm2, %v905_v60, -inf }
 0x445   : > { %910 = vmax.xlane.f32.xlu0 %v909_v61 }
 0x452   : > { %1004 = vrot.lane.b32.xlu1 %v3733_v39, %s3320_s23 }
 0x456   : > { %1084 = vrot.lane.b32.xlu1 %v3735_v41, %s3321_s28 }
 0x45a   : > { %1162 = vrot.lane.b32.xlu1 %v3733_v39, %s3321_s28  ;;  %s4033_s28 = sld [smem:[#allocation29_spill]] }
 0x4ce   : > { %v908_v62 = vpop.xlane.xlu1 %907 }
 0x4cf   : > { %v912_v63 = vsub.f32 %v904_v54, %v908_v62 }
 0x4d1   : > { %v914_v0 = vmul.f32 1.442695, %v912_v63 }
 0x4d2   : > { %v1005_v1 = vpop.permute.xlu1 %1004  ;;  %v911_v2 = vpop.xlane.xlu0 %910 }
 0x4d3   : > { %3011 = vpow2.f32 %v914_v0  ;;  %v913_v3 = vsub.f32 %v905_v60, %v911_v2 }
 0x4d5   : > { %v916_v4 = vmul.f32 1.442695, %v913_v3 }
 0x4d6   : > { %v1085_v5 = vpop.permute.xlu1 %1084 }
 0x4d7   : > { %3013 = vpow2.f32 %v916_v4  ;;  %2770 = vmatpush3.xpose.msk.msra.mxu0 %vm750_vm2, %v1085_v5 }
 0x4d8   : > { %2779 = vmatprep.subr.mxu0 %v3317_v36 }
 0x4da   : > { %v1163_v10 = vpop.permute.xlu1 %1162 }
 0x4dd   : > { %v3012_v6 = vpop.eup %3011 }
 0x4de   : > { %v918_v7 = vsel %vm750_vm2, %v3012_v6, 0.0 }
 0x4df   : > { %919 = vadd.xlane.f32.xlu0 %v918_v7 }
 0x4e1   : > { %v3014_v8 = vpop.eup %3013 }
 0x4e2   : > { %v921_v9 = vsel %vm750_vm2, %v3014_v8, 0.0 }
 0x4e3   : > { %922 = vadd.xlane.f32.xlu1 %v921_v9 }
 0x4f4   : > { %1160 = vrot.lane.b32.xlu1 %v3733_v39, %s3322_s9 }
 0x4f5   : > { %928 = vrot.lane.b32.xlu0 %v3735_v41, %s3320_s23  ;;  %s4036_s23 = sld [smem:[#allocation31_spill]] }
 0x4f9   : > { %1082 = vrot.lane.b32.xlu0 %v3735_v41, %s3322_s9  ;;  %s2681_s9 = sshll.u32 %s3431_s17, 8  ;;  %s2464_s17 = scalar_lea.sflag [#allocation5], %s3676_s24 }
 0x56c   : > { %v920_v11 = vpop.xlane.xlu0 %919 }
 0x56d   : > { %3015 = vrcp.f32 %v920_v11 }
 0x570   : > { %v923_v12 = vpop.xlane.xlu1 %922  ;;  %v929_v13 = vpop.permute.xlu0 %928 }
 0x571   : > { %3017 = vrcp.f32 %v923_v12  ;;  %2760 = vmatpush3.msra.mxu1 %v929_v13 }
 0x572   : > { %2764 = vmatprep.subr.mxu1 %v3317_v36 }
 0x574   : > { %v1083_v14 = vpop.permute.xlu0 %1082  ;;  %v1161_v19 = vpop.permute.xlu1 %1160 }
 0x575   : > { %2772 = vmatmul.mubr.msk.f32.vlgmr.msra.gmra.mrb[2].mxu0 %vm750_vm2, %v1083_v14 }
 0x576   : > { %2781 = vmatprep.mubr.msk.f32.mxu0 %vm3318_vm1, %v3317_v36 }
 0x577   : > { %v3016_v15 = vpop.eup %3015 }
 0x578   : > { %v926_v16 = vmul.f32 %v3016_v15, %v3012_v6 }
 0x57a   : > { %2762 = vmatmul.mubr.msk.f32.vlgmr.msra.gmra.mrb[4].mxu1 %vm750_vm2, %v926_v16 }
 0x57b   : > { %v3018_v17 = vpop.eup %3017  ;;  %2765 = vmatpush3.msra.mxu1 %v1005_v1  ;;  %2766 = vmatprep.mubr.msk.f32.mxu1 %vm3318_vm1, %v3317_v36 }
 0x57c   : > { %v927_v18 = vmul.f32 %v3018_v17, %v3014_v8  ;;  %2774 = vmatprep.subr.mxu1 %v3317_v36 }
 0x57e   : > { %2767 = vmatmul.mubr.msk.f32.vlgmr.msra.gmra.mrb[6].mxu1 %vm750_vm2, %v927_v18 }
 0x57f   : > { %2776 = vmatprep.mubr.msk.f32.mxu1 %vm3318_vm1, %v3317_v36 }
 0x582   : > { %2775 = vmatpush3.xpose.msk.msra.mxu1 %vm750_vm2, %v1163_v10 }
 0x583   : > { %2784 = vmatprep.subr.mxu1 %v3317_v36 }
 0x585   : > { %2777 = vmatmul.mubr.msk.f32.vlgmr.msra.gmra.mrb[8].mxu1 %vm750_vm2, %v1161_v19 }
 0x586   : > { %2786 = vmatprep.mubr.msk.f32.mxu1 %vm3318_vm1, %v3317_v36 }
 0x648   : > { %v1156_v20 = vpop.f32.mrb[2].mxu0 }
 0x649   : > { %v1238_v21 = vmul.f32 0.35355338, %v1156_v20  ;;  %v2773_v22 = vpop.f32.mrb[3].mxu0 }
 0x64b   : > { %v1240_v23 = vadd.f32 %v1238_v21, %v3753_v49 }
 0x64d   : > { %v1000_v24 = vpop.f32.mrb[4].mxu1  ;;  %v1242_v25 = vsel %vm750_vm2, %v1240_v23, -inf }
 0x64e   : > { %1080 = vst.msk [vmem:[#allocation2] sm:$0xff] %vm750_vm2, %v1000_v24  ;;  %1243 = vmax.xlane.f32.xlu0 %v1242_v25  ;;  %v2763_v26 = vpop.f32.mrb[5].mxu1 }
 0x651   : > { %v1076_v27 = vpop.f32.mrb[6].mxu1 }
 0x652   : > { %1081 = vst.msk [vmem:[#allocation2 + $0x8] sm:$0xff] %vm750_vm2, %v1076_v27  ;;  %v2768_v28 = vpop.f32.mrb[7].mxu1 }
 0x658   : > { %v1234_v29 = vpop.f32.mrb[8].mxu1 }
 0x659   : > { %v1239_v30 = vmul.f32 0.35355338, %v1234_v29  ;;  %v2778_v31 = vpop.f32.mrb[9].mxu1 }
 0x65b   : > { %v1241_v32 = vadd.f32 %v1239_v30, %v3757_v55 }
 0x65d   : > { %v1245_v34 = vsel %vm750_vm2, %v1241_v32, -inf }
 0x65e   : > { %1246 = vmax.xlane.f32.xlu1 %v1245_v34 }
 0x66f   : > { %1340 = vrot.lane.b32.xlu1 %v3733_v39, %s3323_s11 }
 0x673   : > { %1429 = vrot.lane.b32.xlu1 %v3735_v41, %s3324_s29 }
 0x677   : > { %1507 = vrot.lane.b32.xlu1 %v3733_v39, %s3324_s29 }
 0x67b   : > { %1505 = vrot.lane.b32.xlu1 %v3733_v39, %s3325_s26 }
 0x6db   : > { %v1244_v37 = vpop.xlane.xlu0 %1243 }
 0x6dc   : > { %v1248_v38 = vsub.f32 %v1240_v23, %v1244_v37 }
 0x6de   : > { %v1250_v40 = vmul.f32 1.442695, %v1248_v38 }
 0x6e0   : > { %3019 = vpow2.f32 %v1250_v40 }
 0x6ea   : > { %v3020_v42 = vpop.eup %3019 }
 0x6eb   : > { %v1247_v43 = vpop.xlane.xlu1 %1246  ;;  %v1254_v44 = vsel %vm750_vm2, %v3020_v42, 0.0 }
 0x6ec   : > { %1255 = vadd.xlane.f32.xlu0 %v1254_v44  ;;  %v1249_v46 = vsub.f32 %v1241_v32, %v1247_v43 }
 0x6ee   : > { %v1252_v47 = vmul.f32 1.442695, %v1249_v46 }
 0x6ef   : > { %v1341_v45 = vpop.permute.xlu1 %1340 }
 0x6f0   : > { %2785 = vmatpush3.msra.mxu1 %v1341_v45  ;;  %3021 = vpow2.f32 %v1252_v47 }
 0x6f1   : > { %2794 = vmatprep.subr.mxu1 %v3317_v36 }
 0x6f3   : > { %v1430_v56 = vpop.permute.xlu1 %1429 }
 0x6f7   : > { %v1508_v60 = vpop.permute.xlu1 %1507 }
 0x6fa   : > { %v3022_v48 = vpop.eup %3021 }
 0x6fb   : > { %v1257_v50 = vsel %vm750_vm2, %v3022_v48, 0.0  ;;  %v1506_v62 = vpop.permute.xlu1 %1505 }
 0x702   : > { %1264 = vrot.lane.b32.xlu0 %v3735_v41, %s3323_s11  ;;  %s581_s11 = scalar_lea.vmem [#allocation14], %s2625_s20 }
 0x703   : > { %s2477_s29 = sshll.u32 %s581_s11, 4  ;;  %s3926_s29 = int_to_ptr.vmem [resolvable:$true] %s2477_s29 }
 0x704   : > { %s3223_s20 = scalar_lea.vmem %s3926_s29, 256 }
 0x705   : > { %p3224_p0 = scmp.ne.s32.totalorder %s3926_s29, %s3223_s20 }
 0x707   : > { %p3225_p6 = pnand %p3224_p0, %p3578_p10 }
 0x709   : > { %p3226_p8 = pneg %p3225_p6 }
 0x721   : > { %1258 = vadd.xlane.f32.xlu0 %v1257_v50 }
 0x737   : > { %1427 = vrot.lane.b32.xlu0 %v3735_v41, %s3325_s26 }
 0x779   : > { %v1256_v51 = vpop.xlane.xlu0 %1255 }
 0x77a   : > { %3023 = vrcp.f32 %v1256_v51 }
 0x77d   : > { %v1265_v52 = vpop.permute.xlu0 %1264 }
 0x77e   : > { %2780 = vmatpush3.msra.mxu0 %v1265_v52 }
 0x77f   : > { %2789 = vmatprep.subr.mxu0 %v3317_v36 }
 0x784   : > { %v3024_v53 = vpop.eup %3023 }
 0x785   : > { %v1262_v54 = vmul.f32 %v3024_v53, %v3020_v42 }
 0x787   : > { %2782 = vmatmul.mubr.msk.f32.vlgmr.msra.gmra.mrb[4].mxu0 %vm750_vm2, %v1262_v54 }
 0x788   : > { %2790 = vmatpush3.xpose.msk.msra.mxu0 %vm750_vm2, %v1430_v56  ;;  %2791 = vmatprep.mubr.msk.f32.mxu0 %vm3318_vm1, %v3317_v36 }
 0x789   : > { %2799 = vmatprep.subr.mxu0 %v3317_v36 }
 0x7ae   : > { %v1259_v57 = vpop.xlane.xlu0 %1258 }
 0x7af   : > { %3025 = vrcp.f32 %v1259_v57 }
 0x7b2   : > { %v1428_v58 = vpop.permute.xlu0 %1427 }
 0x7b3   : > { %2792 = vmatmul.mubr.msk.f32.vlgmr.msra.gmra.mrb[6].mxu0 %vm750_vm2, %v1428_v58 }
 0x7b4   : > { %2801 = vmatprep.mubr.msk.f32.mxu0 %vm3318_vm1, %v3317_v36 }
 0x7b9   : > { %v3026_v59 = vpop.eup %3025 }
 0x7ba   : > { %v1263_v61 = vmul.f32 %v3026_v59, %v3022_v48 }
 0x7bc   : > { %2787 = vmatmul.mubr.msk.f32.vlgmr.msra.gmra.mrb[10].mxu1 %vm750_vm2, %v1263_v61 }
 0x7bd   : > { %2795 = vmatpush3.xpose.msk.msra.mxu1 %vm750_vm2, %v1508_v60  ;;  %2796 = vmatprep.mubr.msk.f32.mxu1 %vm3318_vm1, %v3317_v36 }
 0x7be   : > { %2804 = vmatprep.subr.mxu1 %v3317_v36 }
 0x7c0   : > { %2797 = vmatmul.mubr.msk.f32.vlgmr.msra.gmra.mrb[12].mxu1 %vm750_vm2, %v1506_v62 }
 0x7c1   : > { %2806 = vmatprep.mubr.msk.f32.mxu1 %vm3318_vm1, %v3317_v36 }
 0x85a   : > { %v3820_v63 = vpop.f32.mrb[4].mxu0 }
 0x85b   : > { %v2783_v0 = vpop.f32.mrb[5].mxu0 }
 0x886   : > { %v1501_v1 = vpop.f32.mrb[6].mxu0 }
 0x887   : > { %v1583_v2 = vmul.f32 0.35355338, %v1501_v1  ;;  %v2793_v3 = vpop.f32.mrb[7].mxu0 }
 0x889   : > { %v1585_v4 = vadd.f32 %v1583_v2, %v3753_v49 }
 0x88b   : > { %v1587_v5 = vsel %vm750_vm2, %v1585_v4, -inf }
 0x88c   : > { %1588 = vmax.xlane.f32.xlu0 %v1587_v5 }
 0x88f   : > { %v3824_v6 = vpop.f32.mrb[10].mxu1 }
 0x890   : > { %v2788_v7 = vpop.f32.mrb[11].mxu1 }
 0x893   : > { %v1579_v8 = vpop.f32.mrb[12].mxu1 }
 0x894   : > { %v1584_v9 = vmul.f32 0.35355338, %v1579_v8  ;;  %v2798_v10 = vpop.f32.mrb[13].mxu1 }
 0x895   : > { %v2117_v10 = vld [vmem:[#allocation9] sm:$0xff] }
 0x896   : > { %v1586_v11 = vadd.f32 %v1584_v9, %v3757_v55 }
 0x898   : > { %v1590_v12 = vsel %vm750_vm2, %v1586_v11, -inf }
 0x899   : > { %1591 = vmax.xlane.f32.xlu1 %v1590_v12  ;;  %v2119_v12 = vld [vmem:[#allocation9 + $0x10] sm:$0xff] }
 0x8aa   : > { %1685 = vrot.lane.b32.xlu1 %v3733_v39, %s3326_s0 }
 0x8ae   : > { %1774 = vrot.lane.b32.xlu1 %v3735_v41, %s3327_s6 }
 0x8b2   : > { %1852 = vrot.lane.b32.xlu1 %v3733_v39, %s3327_s6  ;;  %s4037_s6 = sld [smem:[#allocation32_spill]] }
 0x8b6   : > { %1850 = vrot.lane.b32.xlu1 %v3733_v39, %s3328_s21 }
 0x919   : > { %v1589_v13 = vpop.xlane.xlu0 %1588 }
 0x91a   : > { %v1593_v14 = vsub.f32 %v1585_v4, %v1589_v13  ;;  %v2120_v13 = vld [vmem:[#allocation9 + $0x18] sm:$0xff] }
 0x91c   : > { %v1595_v15 = vmul.f32 1.442695, %v1593_v14  ;;  %v2874_v14 = vpack.c.bf16 %v2120_v13, %v2119_v12 }
 0x91e   : > { %3027 = vpow2.f32 %v1595_v15 }
 0x926   : > { %v1592_v16 = vpop.xlane.xlu1 %1591 }
 0x927   : > { %v1594_v20 = vsub.f32 %v1586_v11, %v1592_v16 }
 0x928   : > { %v3028_v17 = vpop.eup %3027 }
 0x929   : > { %v1599_v18 = vsel %vm750_vm2, %v3028_v17, 0.0  ;;  %v1597_v21 = vmul.f32 1.442695, %v1594_v20 }
 0x92a   : > { %1600 = vadd.xlane.f32.xlu0 %v1599_v18  ;;  %v1686_v19 = vpop.permute.xlu1 %1685 }
 0x92b   : > { %2805 = vmatpush3.msra.mxu1 %v1686_v19  ;;  %3029 = vpow2.f32 %v1597_v21 }
 0x92c   : > { %2814 = vmatprep.subr.mxu1 %v3317_v36 }
 0x92e   : > { %v1775_v28 = vpop.permute.xlu1 %1774 }
 0x932   : > { %v1853_v32 = vpop.permute.xlu1 %1852 }
 0x935   : > { %v3030_v22 = vpop.eup %3029 }
 0x936   : > { %v1602_v23 = vsel %vm750_vm2, %v3030_v22, 0.0  ;;  %v1851_v37 = vpop.permute.xlu1 %1850 }
 0x940   : > { %1609 = vrot.lane.b32.xlu0 %v3735_v41, %s3326_s0 }
 0x95f   : > { %1603 = vadd.xlane.f32.xlu0 %v1602_v23  ;;  %v2663_v23 = vld [vmem:[%s4032_s4] ss:$0 sm:$0xff] }
 0x975   : > { %1772 = vrot.lane.b32.xlu0 %v3735_v41, %s3328_s21  ;;  %s3923_s21 = scalar_lea.hbm %s4037_s6, %s2681_s9 }
 0x9b7   : > { %v1601_v24 = vpop.xlane.xlu0 %1600 }
 0x9b8   : > { %3031 = vrcp.f32 %v1601_v24 }
 0x9bb   : > { %v1610_v25 = vpop.permute.xlu0 %1609 }
 0x9bc   : > { %2800 = vmatpush3.msra.mxu0 %v1610_v25 }
 0x9bd   : > { %2809 = vmatprep.subr.mxu0 %v3317_v36 }
 0x9c2   : > { %v3032_v26 = vpop.eup %3031 }
 0x9c3   : > { %v1607_v27 = vmul.f32 %v3032_v26, %v3028_v17 }
 0x9c5   : > { %2802 = vmatmul.mubr.msk.f32.vlgmr.msra.gmra.mrb[8].mxu0 %vm750_vm2, %v1607_v27 }
 0x9c6   : > { %2810 = vmatpush3.xpose.msk.msra.mxu0 %vm750_vm2, %v1775_v28  ;;  %2811 = vmatprep.mubr.msk.f32.mxu0 %vm3318_vm1, %v3317_v36 }
 0x9c7   : > { %2819 = vmatprep.subr.mxu0 %v3317_v36 }
 0x9ec   : > { %v1604_v29 = vpop.xlane.xlu0 %1603 }
 0x9ed   : > { %3033 = vrcp.f32 %v1604_v29 }
 0x9f0   : > { %v1773_v30 = vpop.permute.xlu0 %1772 }
 0x9f1   : > { %2812 = vmatmul.mubr.msk.f32.vlgmr.msra.gmra.mrb[10].mxu0 %vm750_vm2, %v1773_v30 }
 0x9f2   : > { %2821 = vmatprep.mubr.msk.f32.mxu0 %vm3318_vm1, %v3317_v36 }
 0x9f7   : > { %v3034_v31 = vpop.eup %3033 }
 0x9f8   : > { %v1608_v34 = vmul.f32 %v3034_v31, %v3030_v22 }
 0x9fa   : > { %2807 = vmatmul.mubr.msk.f32.vlgmr.msra.gmra.mrb[14].mxu1 %vm750_vm2, %v1608_v34 }
 0x9fb   : > { %2815 = vmatpush3.xpose.msk.msra.mxu1 %vm750_vm2, %v1853_v32  ;;  %2816 = vmatprep.mubr.msk.f32.mxu1 %vm3318_vm1, %v3317_v36 }
 0x9fc   : > { %2824 = vmatprep.subr.mxu1 %v3317_v36 }
 0x9fe   : > { %2817 = vmatmul.mubr.msk.f32.vlgmr.msra.gmra.mrb[16].mxu1 %vm750_vm2, %v1851_v37 }
 0x9ff   : > { %2826 = vmatprep.mubr.msk.f32.mxu1 %vm3318_vm1, %v3317_v36 }
 0xa98   : > { %v1681_v38 = vpop.f32.mrb[8].mxu0 }
 0xa99   : > { %v2803_v40 = vpop.f32.mrb[9].mxu0 }
 0xac4   : > { %v1846_v42 = vpop.f32.mrb[10].mxu0 }
 0xac5   : > { %v1928_v43 = vmul.f32 0.35355338, %v1846_v42  ;;  %v2813_v44 = vpop.f32.mrb[11].mxu0 }
 0xac7   : > { %v1930_v45 = vadd.f32 %v1928_v43, %v3753_v49 }
 0xac9   : > { %v1932_v46 = vsel %vm750_vm2, %v1930_v45, -inf }
 0xaca   : > { %1933 = vmax.xlane.f32.xlu0 %v1932_v46  ;;  %v2258_v46 = vld [vmem:[%s4033_s28 + $0x8] sm:$0xff] }
 0xacd   : > { %v1757_v47 = vpop.f32.mrb[14].mxu1 }
 0xace   : > { %v2808_v48 = vpop.f32.mrb[15].mxu1 }
 0xacf   : > { %v2259_v48 = vld [vmem:[%s4033_s28 + $0x10] sm:$0xff] }
 0xad1   : > { %v1924_v50 = vpop.f32.mrb[16].mxu1 }
 0xad2   : > { %v1929_v51 = vmul.f32 0.35355338, %v1924_v50  ;;  %v2818_v52 = vpop.f32.mrb[17].mxu1  ;;  %v2260_v50 = vld [vmem:[%s4033_s28 + $0x18] sm:$0xff] }
 0xad4   : > { %v1931_v53 = vadd.f32 %v1929_v51, %v3757_v55  ;;  %v2882_v51 = vpack.c.bf16 %v2260_v50, %v2259_v48 }
 0xad6   : > { %v1935_v54 = vsel %vm750_vm2, %v1931_v53, -inf }
 0xad7   : > { %1936 = vmax.xlane.f32.xlu1 %v1935_v54 }
 0xae8   : > { %2030 = vrot.lane.b32.xlu1 %v3733_v39, %s3329_s8 }
 0xaec   : > { %1418 = vrot.lane.b32.xlu1 %v3820_v63, %s3330_s19 }
 0xaf0   : > { %1420 = vrot.lane.b32.xlu1 %v3824_v6, %s3330_s19 }
 0xaf4   : > { %1765 = vrot.lane.b32.xlu1 %v1757_v47, %s3331_s27 }
 0xb57   : > { %v1934_v36 = vpop.xlane.xlu0 %1933 }
 0xb58   : > { %v1938_v49 = vsub.f32 %v1930_v45, %v1934_v36  ;;  %v2257_v45 = vld [vmem:[%s4033_s28] sm:$0xff] }
 0xb59   : > { %v2878_v47 = vpack.c.bf16 %v2258_v46, %v2257_v45 }
 0xb5a   : > { %v1940_v56 = vmul.f32 1.442695, %v1938_v49 }
 0xb5c   : > { %3035 = vpow2.f32 %v1940_v56 }
 0xb64   : > { %v1937_v55 = vpop.xlane.xlu1 %1936 }
 0xb65   : > { %v1939_v57 = vsub.f32 %v1931_v53, %v1937_v55 }
 0xb66   : > { %v3036_v58 = vpop.eup %3035 }
 0xb67   : > { %v1942_v59 = vmul.f32 1.442695, %v1939_v57  ;;  %v1944_v60 = vsel %vm750_vm2, %v3036_v58, 0.0 }
 0xb68   : > { %1945 = vadd.xlane.f32.xlu0 %v1944_v60  ;;  %v2031_v39 = vpop.permute.xlu1 %2030 }
 0xb69   : > { %3037 = vpow2.f32 %v1942_v59  ;;  %2825 = vmatpush3.msra.mxu1 %v2031_v39  ;;  %v2667_v59 = vld [vmem:[#allocation11] ss:$0 sm:$0xff] }
 0xb6a   : > { %2879 = vmatprep.subr.bf16.mxu1 %v2878_v47 }
 0xb6c   : > { %v1419_v61 = vpop.permute.xlu1 %1418 }
 0xb6d   : > { %1425 = vst.msk [vmem:[#allocation2] sm:$0xff] %vm1424_vm4, %v1419_v61 }
 0xb70   : > { %v1421_v62 = vpop.permute.xlu1 %1420 }
 0xb71   : > { %1426 = vst.msk [vmem:[#allocation2 + $0x8] sm:$0xff] %vm1424_vm4, %v1421_v62 }
 0xb73   : > { %v3038_v63 = vpop.eup %3037 }
 0xb74   : > { %v1766_v0 = vpop.permute.xlu1 %1765  ;;  %v1947_v1 = vsel %vm750_vm2, %v3038_v63, 0.0 }
 0xb75   : > { %1771 = vst.msk [vmem:[#allocation2 + $0x8] sm:$0xff] %vm1769_vm5, %v1766_v0  ;;  %1948 = vadd.xlane.f32.xlu0 %v1947_v1  ;;  %v2367_v1 = vld [vmem:[#allocation12] sm:$0xff] }
 0xb8b   : > { %1954 = vrot.lane.b32.xlu0 %v3735_v41, %s3329_s8  ;;  %v2118_v41 = vld [vmem:[#allocation9 + $0x8] sm:$0xff]  ;;  %s3333_s8 = smov [#allocation14]  }
 0xb8c   : > { %v2870_v11 = vpack.c.bf16 %v2118_v41, %v2117_v10 }
 0xb8f   : > { %1763 = vrot.lane.b32.xlu0 %v1681_v38, %s3331_s27  ;;  %s4034_s27 = sld [smem:[#allocation27_spill]] }
 0xb95   : > { %v2666_v57 = vld [vmem:[%s4034_s27] ss:$0 sm:$0xff]  ;;  %s3227_s27 = sshll.u32 %s3333_s8, 4  ;;  %s3228_s27 = int_to_ptr.vmem [resolvable:$false] %s3227_s27 }
 0xb96   : > { %p3230_p3 = scmp.lt.s32.totalorder %s3926_s29, %s3228_s27 }
 0xbf5   : > { %v1946_v2 = vpop.xlane.xlu0 %1945 }
 0xbf6   : > { %3039 = vrcp.f32 %v1946_v2  ;;  %v2368_v2 = vld [vmem:[#allocation12 + $0x8] sm:$0xff] }
 0xc00   : > { %v3040_v4 = vpop.eup %3039 }
 0xc01   : > { %v1952_v5 = vmul.f32 %v3040_v4, %v3036_v58  ;;  %v2886_v4 = vpack.c.bf16 %v2368_v2, %v2367_v1 }
 0xc02   : > { %v1949_v3 = vpop.xlane.xlu0 %1948 }
 0xc03   : > { %3041 = vrcp.f32 %v1949_v3  ;;  %v2369_v3 = vld [vmem:[#allocation12 + $0x10] sm:$0xff] }
 0xc06   : > { %v1955_v6 = vpop.permute.xlu0 %1954 }
 0xc07   : > { %2820 = vmatpush3.msra.mxu0 %v1955_v6 }
 0xc08   : > { %2822 = vmatmul.mubr.msk.f32.vlgmr.msra.gmra.mrb[12].mxu0 %vm750_vm2, %v1952_v5  ;;  %2871 = vmatprep.subr.bf16.mxu0 %v2870_v11  ;;  %v2370_v5 = vld [vmem:[#allocation12 + $0x18] sm:$0xff] }
 0xc09   : > { %2873 = vmatpush3.bf16.msra.mxu0 %v2870_v11  ;;  %v2890_v6 = vpack.c.bf16 %v2370_v5, %v2369_v3 }
 0xc0a   : > { %v1764_v7 = vpop.permute.xlu0 %1763  ;;  %2875 = vmatprep.subr.bf16.mxu0 %v2874_v14 }
 0xc0b   : > { %1770 = vst.msk [vmem:[#allocation2] sm:$0xff] %vm1769_vm5, %v1764_v7  ;;  %v2668_v7 = vld [vmem:[%s4035_s14] ss:$0 sm:$0xff] }
 0xc0d   : > { %v3042_v8 = vpop.eup %3041  ;;  %2877 = vmatpush3.bf16.msra.mxu0 %v2874_v14 }
 0xc0e   : > { %v1953_v9 = vmul.f32 %v3042_v8, %v3038_v63  ;;  %2887 = vmatprep.subr.bf16.mxu0 %v2886_v4 }
 0xc10   : > { %2827 = vmatmul.mubr.msk.f32.vlgmr.msra.gmra.mrb[18].mxu1 %vm750_vm2, %v1953_v9 }
 0xc11   : > { %2881 = vmatpush3.bf16.msra.mxu1 %v2878_v47 }
 0xc12   : > { %2883 = vmatprep.subr.bf16.mxu1 %v2882_v51 }
 0xc15   : > { %2885 = vmatpush3.bf16.msra.mxu1 %v2882_v51 }
 0xcdb   : > { %v2026_v15 = vpop.f32.mrb[12].mxu0 }
 0xcdc   : > { %2108 = vrot.lane.b32.xlu0 %v2026_v15, %s3332_s25  ;;  %v2823_v16 = vpop.f32.mrb[13].mxu0 }
 0xce3   : > { %v2102_v17 = vpop.f32.mrb[18].mxu1 }
 0xce4   : > { %2110 = vrot.lane.b32.xlu1 %v2102_v17, %s3332_s25  ;;  %v2828_v18 = vpop.f32.mrb[19].mxu1  ;;  %s3229_s25 = scalar_lea.vmem %s3228_s27, 512 }
 0xce5   : > { %p3231_p5 = scmp.lt.s32.totalorder %s3229_s25, %s3223_s20 }
 0xce7   : > { %p3232_p9 = por %p3231_p5, %p3230_p3 }
 0xce9   : > { %p3233_p4 = pnand %p3232_p9, %p3226_p8 }
 0xd4e   : > { %v2109_v19 = vpop.permute.xlu0 %2108 }
 0xd4f   : > { %2115 = vst.msk [vmem:[#allocation2] sm:$0xff] %vm2114_vm6, %v2109_v19 }
 0xd56   : > { %v2111_v20 = vpop.permute.xlu1 %2110  ;;  %v2121_v21 = vld [vmem:[#allocation2] sm:$0xff] }
 0xd57   : > { %2116 = vst.msk [vmem:[#allocation2 + $0x8] sm:$0xff] %vm2114_vm6, %v2111_v20  ;;  %2837 = vmatprep.mubr.msk.f32.mxu0 %vm589_vm0, %v2121_v21 }
 0xd5e   : > { %v2122_v22 = vld [vmem:[#allocation2 + $0x8] sm:$0xff] }
 0xd5f   : > { %2838 = vmatmul.mubr.msk.f32.vlgmr.msra.gmra.mrb[14].mxu0 %vm589_vm0, %v2122_v22 }
 0xd60   : > { %2889 = vmatpush3.bf16.msra.mxu0 %v2886_v4 }
 0xd61   : > { %2891 = vmatprep.subr.bf16.mxu0 %v2890_v6 }
 0xd64   : > { %2893 = vmatpush3.bf16.msra.mxu0 %v2890_v6 }
 0xe32   : > { %v2839_v24 = vpop.f32.mrb[14].mxu0 }
 0xe33   : > { %v2208_v25 = vadd.f32 %v2839_v24, %v2663_v23  ;;  %v2202_v26 = vpop.f32.mrb[15].mxu0 }
 0xe34   : > { %v2203_v27 = vadd.f32 %v2663_v23, %v2202_v26 }
 0xe35   : > { %v3878_v28 = vadd.f32 %v2208_v25, %v3720_v35 }
 0xe36   : > { %v3881_v29 = vadd.f32 %v2203_v27, %v3716_v33 }
 0xe37   : > { %v2218_v30 = vsel %vm589_vm0, %v3878_v28, 0.0 }
 0xe38   : > { %2219 = vadd.xlane.f32.xlu1 %v2218_v30  ;;  %v2215_v31 = vsel %vm589_vm0, %v3881_v29, 0.0 }
 0xe39   : > { %2216 = vadd.xlane.f32.xlu0 %v2215_v31  ;;  %v2671_v31 = vld [vmem:[%s4036_s23] ss:$0 sm:$0xff] }
 0xec5   : > { %v2220_v32 = vpop.xlane.xlu1 %2219 }
 0xec6   : > { %v2222_v34 = vmul.f32 0.03125, %v2220_v32  ;;  %v2217_v37 = vpop.xlane.xlu0 %2216 }
 0xec7   : > { %v2221_v38 = vmul.f32 0.03125, %v2217_v37 }
 0xec8   : > { %v2224_v40 = vsub.f32 %v3878_v28, %v2222_v34 }
 0xec9   : > { %v2223_v35 = vsub.f32 %v3881_v29, %v2221_v38 }
 0xeca   : > { %v2226_v43 = vmul.f32 %v2224_v40, %v2224_v40 }
 0xecb   : > { %v2225_v42 = vmul.f32 %v2223_v35, %v2223_v35 }
 0xecc   : > { %v2230_v44 = vsel %vm589_vm0, %v2226_v43, 0.0 }
 0xecd   : > { %v2227_v33 = vsel %vm589_vm0, %v2225_v42, 0.0 }
 0xece   : > { %2228 = vadd.xlane.f32.xlu0 %v2227_v33 }
 0xed2   : > { %2231 = vadd.xlane.f32.xlu0 %v2230_v44 }
 0xf5b   : > { %v2229_v52 = vpop.xlane.xlu0 %2228 }
 0xf5c   : > { %v2233_v53 = vmul.f32 0.03125, %v2229_v52 }
 0xf5e   : > { %v2235_v54 = vadd.f32 1e-05, %v2233_v53 }
 0xf5f   : > { %v2232_v36 = vpop.xlane.xlu0 %2231 }
 0xf60   : > { %3043 = vrsqrt.f32 %v2235_v54  ;;  %v2234_v49 = vmul.f32 0.03125, %v2232_v36 }
 0xf62   : > { %v2236_v56 = vadd.f32 1e-05, %v2234_v49 }
 0xf64   : > { %3045 = vrsqrt.f32 %v2236_v56 }
 0xf6a   : > { %v3044_v55 = vpop.eup %3043 }
 0xf6b   : > { %v2239_v58 = vmul.f32 %v3044_v55, %v2223_v35 }
 0xf6d   : > { %v2247_v60 = vmul.f32 %v2666_v57, %v2239_v58 }
 0xf6e   : > { %v3046_v39 = vpop.eup %3045 }
 0xf6f   : > { %v2240_v61 = vmul.f32 %v3046_v39, %v2224_v40  ;;  %v2255_v62 = vadd.f32 %v2667_v59, %v2247_v60 }
 0xf71   : > { %v2248_v63 = vmul.f32 %v2666_v57, %v2240_v61  ;;  %2848 = vmatprep.mubr.msk.f32.mxu1 %vm589_vm0, %v2255_v62 }
 0xf73   : > { %v2256_v0 = vadd.f32 %v2667_v59, %v2248_v63 }
 0xf75   : > { %2849 = vmatmul.mubr.msk.f32.vlgmr.msra.gmra.mrb[20].mxu1 %vm589_vm0, %v2256_v0 }
0x1048   : > { %v2850_v8 = vpop.f32.mrb[20].mxu1 }
0x1049   : > { %v2346_v9 = vadd.f32 %v2850_v8, %v2668_v7  ;;  %v2340_v10 = vpop.f32.mrb[21].mxu1 }
0x104a   : > { %v2341_v41 = vadd.f32 %v2668_v7, %v2340_v10 }
0x104b   : > { %v2352_v11 = vmul.f32 0.044715, %v2346_v9  ;;  %v2350_v26 = vmul.f32 0.5, %v2346_v9 }
0x104c   : > { %v2351_v12 = vmul.f32 0.044715, %v2341_v41  ;;  %v2349_v24 = vmul.f32 0.5, %v2341_v41 }
0x104d   : > { %v2354_v13 = vmul.f32 %v2352_v11, %v2346_v9 }
0x104e   : > { %v2353_v14 = vmul.f32 %v2351_v12, %v2341_v41 }
0x104f   : > { %v2356_v15 = vmul.f32 %v2354_v13, %v2346_v9 }
0x1050   : > { %v2355_v16 = vmul.f32 %v2353_v14, %v2341_v41 }
0x1051   : > { %v2358_v17 = vadd.f32 %v2356_v15, %v2346_v9 }
0x1052   : > { %v2357_v18 = vadd.f32 %v2355_v16, %v2341_v41 }
0x1053   : > { %v2360_v19 = vmul.f32 0.7978846, %v2358_v17 }
0x1054   : > { %v2359_v20 = vmul.f32 0.7978846, %v2357_v18 }
0x1055   : > { %3047 = vtanh.f32 %v2360_v19 }
0x1056   : > { %3049 = vtanh.f32 %v2359_v20 }
0x105f   : > { %v3048_v21 = vpop.eup %3047 }
0x1060   : > { %v3050_v22 = vpop.eup %3049  ;;  %v2364_v23 = vadd.f32 1.0, %v3048_v21 }
0x1061   : > { %v2363_v25 = vadd.f32 1.0, %v3050_v22 }
0x1062   : > { %v2366_v30 = vmul.f32 %v2364_v23, %v2350_v26 }
0x1063   : > { %v2365_v27 = vmul.f32 %v2363_v25, %v2349_v24 }
0x1065   : > { %2859 = vmatprep.mubr.msk.f32.mxu0 %vm589_vm0, %v2365_v27 }
0x1066   : > { %2860 = vmatmul.mubr.msk.f32.vlgmr.msra.gmra.mrb[16].mxu0 %vm589_vm0, %v2366_v30 }
0x1139   : > { %v2861_v32 = vpop.f32.mrb[16].mxu0 }
0x113a   : > { %v2456_v34 = vadd.f32 %v2861_v32, %v2671_v31  ;;  %v2450_v37 = vpop.f32.mrb[17].mxu0 }
0x113b   : > { %v2451_v38 = vadd.f32 %v2671_v31, %v2450_v37 }
0x113c   : > { %v2460_v40 = vadd.f32 %v2456_v34, %v3878_v28 }
0x113d   : > { %v2459_v35 = vadd.f32 %v2451_v38, %v3881_v29 }
0x113e   : > { %2462 = vst.msk [vmem:[%s581_s11 + $0x8] sm:$0xff] %vm589_vm0, %v2460_v40 }
0x113f   : > { %2461 = vst.msk [vmem:[%s581_s11] sm:$0xff] %vm589_vm0, %v2459_v35 }
0x1140   : > { %3236 = shalt.err (!%p3233_p4)
}
0x1141   : > { %s3237_s7 = scalar_lea.hbm %s3923_s21, 256  ;;  %s3241_s10 = scalar_lea.hbm %s4037_s6, 512 }
0x1142   : > { %p3238_p11 = scmp.ne.s32.totalorder %s3923_s21, %s3237_s7  ;;  %p3242_p1 = scmp.lt.u32.totalorder %s3923_s21, %s4037_s6 }
0x1143   : > { %p3243_p2 = scmp.lt.u32.totalorder %s3241_s10, %s3237_s7  ;;  %p3245_p0 = scmp.lt.u32.totalorder %s3237_s7, %s3923_s21 }
0x1144   : > { %p3239_p7 = pnand %p3238_p11, %p3578_p10 }
0x1145   : > { %p3244_p13 = por %p3243_p2, %p3242_p1 }
0x1146   : > { %p3240_p12 = pneg %p3239_p7 }
0x1147   : > { %p3246_p6 = por %p3245_p0, %p3244_p13 }
0x1149   : > { %p3247_p8 = pnand %p3246_p6, %p3240_p12 }
0x114b   : > { %3250 = shalt.err (!%p3247_p8)
}
0x114c   : > { %s3334_s11 = smov 128  }
0x114d   : > { %2914 = dma.vmem_to_hbm [thread:$0]  (%p3578_p10), %s3926_s29, 256, %s3923_s21, %s2464_s17, %s3334_s11, %s3334_s11, %s3330_s19  }
0x114e PF: > { %s4038_s26 = sld [smem:[#allocation21_spill]]  ;;  %s4039_s0 = sld [smem:[#allocation22_spill]] }
0x114f   : > { %p4041_p5 = scmp.ge.s32.totalorder %s3305_s16, 2 }
0x1154   : > { %s2492_s20 = sand.u32 1, %s4038_s26   ;;  %p4040_p3 = scmp.ne.s32.totalorder %s4039_s0, 0 }
0x1155   : > { %s2493_s8 = scalar_lea.sflag [#allocation5], %s2492_s20 }
0x1156   : > { %p2937_p9 = pnand %p4041_p5, %p4040_p3 }
0x1158   : > { %3288 = dma.done.wait (!%p2937_p9), %s2493_s8, 256  }
0x1159   : > { %3290 = vsyncadd (!%p2937_p9), %s2493_s8, 4294967040  ;;  %p32_p4 = scmp.ge.s32.totalorder %s3568_s13, 4   ;;  %s4042_s29 = smov %s3297_s30 }
0x115a   : > { %s4043_s30 = smov %s3301_s15  ;;  %s4044_s15 = smov %s3584_s22 }
0x115b   : > { %s4045_s16 = smov %s3568_s13  ;;  %34 = sbr.rel (!%p32_p4) target bundleno = 20 (0x14), region = 150 }
0x1162   :  { %2498 = vsyncpa [#allocation4], 1 }
0x1163   :  { %2500 = vsyncpa [#allocation4 + $0x1], 1 }
0x1164   :  { %2501 = vsyncpa [#allocation7], 1 }
0x1165   :  { %2503 = vsyncpa [#allocation7 + $0x1], 1 }
0x1166   :  { %2504 = vsyncpa [#allocation10], 1 }
0x1167   :  { %2505 = vsyncpa [#allocation13], 1 }
0x1168   :  { %2506 = vsyncpa [#allocation5], 1 }
0x1169   :  { %2508 = vsyncpa [#allocation5 + $0x1], 1 }

</bundles_post_ra>
